<compile_context>
chip_gen: v6e
topology: v6e:2x2x1
jax: 0.10.0
libtpu: 0.0.40
codegen_flags: <defaults>
</compile_context>

<pallas_src>
import functools
import math

import jax
import jax.numpy as jnp
from jax.experimental import pallas as pl
from jax.experimental.pallas import tpu as pltpu

_VMEM_LIMIT = 48 * 1024 * 1024   # explicit scoped-VMEM budget; safe on v5e/v6e/v7x


# ---------------------------------------------------------------------------
# Tiling helper
# ---------------------------------------------------------------------------

def _pick_tile(dim, target):
    """Full dim if it is <= target, else the largest 128-aligned divisor <= target.
    Only falls back to the full dim when no 128-aligned divisor exists (avoids illegal
    (8,128)-misaligned blocks)."""
    if dim <= target:
        return dim
    t = target
    while t >= 128:
        if dim % t == 0:
            return t
        t -= 128
    return dim


# ---------------------------------------------------------------------------
# Tiled linear kernel:  y = x @ w_t + b   (w_t pre-transposed to (K, N), bf16)
# ---------------------------------------------------------------------------

def _matmul_kernel(x_ref, w_ref, b_ref, o_ref, acc_ref):
    @pl.when(pl.program_id(2) == 0)
    def _():
        acc_ref[...] = jnp.zeros_like(acc_ref)

    acc_ref[...] += jnp.dot(x_ref[...].astype(jnp.bfloat16), w_ref[...],
                            preferred_element_type=jnp.float32)

    @pl.when(pl.program_id(2) == pl.num_programs(2) - 1)
    def _():
        o_ref[...] = acc_ref[...] + b_ref[...]


def linear(x2d, w_t, b, tm=256, tn=512, tk=512):
    """y = x2d @ w_t + b; bf16 operands, f32 accumulation, pipelined over (M,N,K)."""
    M, K = x2d.shape
    N = w_t.shape[1]
    bm, bn, bk = _pick_tile(M, tm), _pick_tile(N, tn), _pick_tile(K, tk)
    grid = (M // bm, N // bn, K // bk)
    return pl.pallas_call(
        _matmul_kernel,
        out_shape=jax.ShapeDtypeStruct((M, N), jnp.float32),
        grid_spec=pltpu.PrefetchScalarGridSpec(
            num_scalar_prefetch=0,
            grid=grid,
            in_specs=[pl.BlockSpec((bm, bk), lambda i, j, k: (i, k)),
                      pl.BlockSpec((bk, bn), lambda i, j, k: (k, j)),
                      pl.BlockSpec((1, bn), lambda i, j, k: (0, j))],
            out_specs=pl.BlockSpec((bm, bn), lambda i, j, k: (i, j)),
            scratch_shapes=[pltpu.VMEM((bm, bn), jnp.float32)]),
        compiler_params=pltpu.CompilerParams(
            dimension_semantics=("parallel", "parallel", "arbitrary"),
            vmem_limit_bytes=_VMEM_LIMIT),
    )(x2d, w_t, b.reshape(1, N))


# ---------------------------------------------------------------------------
# Multi-head cross-attention with flash-style Lk tiling, fused output projection,
# residual add, and LayerNorm (norm1) in the epilogue.
# ---------------------------------------------------------------------------

def _mha_ln_kernel(q_ref, k_ref, v_ref, wo_ref, bo_ref, x_ref, g_ref, b_ref,
                   o_ref, m_sc, l_sc, acc_sc, cat_sc, *, scale, dh):
    ki = pl.program_id(2)

    @pl.when(ki == 0)
    def _():
        m_sc[...] = jnp.full(m_sc.shape, -jnp.inf, m_sc.dtype)
        l_sc[...] = jnp.zeros(l_sc.shape, l_sc.dtype)
        acc_sc[...] = jnp.zeros(acc_sc.shape, acc_sc.dtype)

    q = (q_ref[0] * scale).astype(jnp.bfloat16)      # (H, bq, Dh), 1/sqrt(Dh) folded on q
    k = k_ref[0].astype(jnp.bfloat16)                # (H, bk, Dh)
    v = v_ref[0].astype(jnp.bfloat16)                # (H, bk, Dh)

    s = jnp.einsum('hqd,hkd->hqk', q, k, preferred_element_type=jnp.float32)
    m_prev = m_sc[...]
    m_new = jnp.maximum(m_prev, jnp.max(s, axis=-1, keepdims=True))
    alpha = jnp.exp(m_prev - m_new)
    p = jnp.exp(s - m_new)
    l_sc[...] = alpha * l_sc[...] + jnp.sum(p, axis=-1, keepdims=True)
    acc_sc[...] = alpha * acc_sc[...] + jnp.einsum(
        'hqk,hkd->hqd', p.astype(jnp.bfloat16), v, preferred_element_type=jnp.float32)
    m_sc[...] = m_new

    @pl.when(ki == pl.num_programs(2) - 1)
    def _():
        ctx = acc_sc[...] / l_sc[...]                # exact softmax normalization (H,bq,Dh)
        nheads = ctx.shape[0]
        # Concat heads into a lane-contiguous (bq, E) scratch (cheap static column stores;
        # Mosaic dot_general does not support a 2-contracting-dim einsum directly), then a
        # SINGLE output-projection matmul with contraction K = E (full MXU depth).
        for h in range(nheads):
            cat_sc[:, h * dh:(h + 1) * dh] = ctx[h]
        attn = jnp.dot(cat_sc[...].astype(jnp.bfloat16), wo_ref[...],
                       preferred_element_type=jnp.float32) + bo_ref[...]
        y = x_ref[0] + attn                          # residual add (dropout1 = identity)
        mu = jnp.mean(y, axis=-1, keepdims=True)
        var = jnp.mean(jnp.square(y - mu), axis=-1, keepdims=True)
        o_ref[0] = (y - mu) * jax.lax.rsqrt(var + 1e-5) * g_ref[...] + b_ref[...]


def mha_ln(qh, kh, vh, wo, bo, x_res, gamma, beta, scale, tq=256, tk=512):
    """LayerNorm(x + out_proj(softmax(q k^T * scale) v)); grid (B, Lq tiles, Lk tiles)."""
    B, H, Lq, Dh = qh.shape
    Lk = kh.shape[2]
    E = H * Dh
    bq = _pick_tile(Lq, tq)
    bk = _pick_tile(Lk, tk)
    grid = (B, Lq // bq, Lk // bk)
    return pl.pallas_call(
        functools.partial(_mha_ln_kernel, scale=scale, dh=Dh),
        out_shape=jax.ShapeDtypeStruct((B, Lq, E), jnp.float32),
        grid_spec=pltpu.PrefetchScalarGridSpec(
            num_scalar_prefetch=0,
            grid=grid,
            in_specs=[
                pl.BlockSpec((1, H, bq, Dh), lambda b, qi, ki: (b, 0, qi, 0)),
                pl.BlockSpec((1, H, bk, Dh), lambda b, qi, ki: (b, 0, ki, 0)),
                pl.BlockSpec((1, H, bk, Dh), lambda b, qi, ki: (b, 0, ki, 0)),
                pl.BlockSpec((E, E), lambda b, qi, ki: (0, 0)),
                pl.BlockSpec((1, E), lambda b, qi, ki: (0, 0)),
                pl.BlockSpec((1, bq, E), lambda b, qi, ki: (b, qi, 0)),
                pl.BlockSpec((1, E), lambda b, qi, ki: (0, 0)),
                pl.BlockSpec((1, E), lambda b, qi, ki: (0, 0)),
            ],
            out_specs=pl.BlockSpec((1, bq, E), lambda b, qi, ki: (b, qi, 0)),
            scratch_shapes=[pltpu.VMEM((H, bq, 1), jnp.float32),   # running max
                            pltpu.VMEM((H, bq, 1), jnp.float32),   # running denom
                            pltpu.VMEM((H, bq, Dh), jnp.float32),  # running context
                            pltpu.VMEM((bq, E), jnp.float32)]),    # concat-heads buffer
        compiler_params=pltpu.CompilerParams(
            dimension_semantics=("parallel", "parallel", "arbitrary"),
            vmem_limit_bytes=_VMEM_LIMIT),
    )(qh, kh, vh, wo, bo.reshape(1, E), x_res, gamma.reshape(1, E), beta.reshape(1, E))


# ---------------------------------------------------------------------------
# Fused FFN: LayerNorm(x + linear2(relu(linear1(x)))); hidden tile never leaves VMEM.
# ---------------------------------------------------------------------------

def _ffn_ln_kernel(x_ref, w1_ref, b1_ref, w2_ref, b2_ref, g_ref, b_ref, o_ref):
    x = x_ref[...]
    h = jnp.dot(x.astype(jnp.bfloat16), w1_ref[...],
                preferred_element_type=jnp.float32) + b1_ref[...]
    h = jnp.maximum(h, 0.0)                           # ReLU (dropout = identity)
    f = jnp.dot(h.astype(jnp.bfloat16), w2_ref[...],
                preferred_element_type=jnp.float32) + b2_ref[...]
    y = x + f                                         # residual (dropout2 = identity)
    mu = jnp.mean(y, axis=-1, keepdims=True)
    var = jnp.mean(jnp.square(y - mu), axis=-1, keepdims=True)
    o_ref[...] = (y - mu) * jax.lax.rsqrt(var + 1e-5) * g_ref[...] + b_ref[...]


def ffn_ln(x2d, w1, b1, w2, b2, gamma, beta, tm=256):
    M, E = x2d.shape
    F = w1.shape[1]
    bm = _pick_tile(M, tm)
    # TODO(synk): for very large E*dim_forward, add a K/N tile axis over the weights.
    return pl.pallas_call(
        _ffn_ln_kernel,
        out_shape=jax.ShapeDtypeStruct((M, E), jnp.float32),
        grid_spec=pltpu.PrefetchScalarGridSpec(
            num_scalar_prefetch=0,
            grid=(M // bm,),
            in_specs=[pl.BlockSpec((bm, E), lambda i: (i, 0)),
                      pl.BlockSpec((E, F), lambda i: (0, 0)),
                      pl.BlockSpec((1, F), lambda i: (0, 0)),
                      pl.BlockSpec((F, E), lambda i: (0, 0)),
                      pl.BlockSpec((1, E), lambda i: (0, 0)),
                      pl.BlockSpec((1, E), lambda i: (0, 0)),
                      pl.BlockSpec((1, E), lambda i: (0, 0))],
            out_specs=pl.BlockSpec((bm, E), lambda i: (i, 0))),
        compiler_params=pltpu.CompilerParams(
            dimension_semantics=("parallel",),
            vmem_limit_bytes=_VMEM_LIMIT),
    )(x2d, w1, b1.reshape(1, F), w2, b2.reshape(1, E),
      gamma.reshape(1, E), beta.reshape(1, E))


# ---------------------------------------------------------------------------
# Plain LayerNorm (final decoder norm)
# ---------------------------------------------------------------------------

def _ln_kernel(x_ref, g_ref, b_ref, o_ref):
    y = x_ref[...]
    mu = jnp.mean(y, axis=-1, keepdims=True)
    var = jnp.mean(jnp.square(y - mu), axis=-1, keepdims=True)
    o_ref[...] = (y - mu) * jax.lax.rsqrt(var + 1e-5) * g_ref[...] + b_ref[...]


def layernorm(x2d, gamma, beta, tm=512):
    M, E = x2d.shape
    bm = _pick_tile(M, tm)
    return pl.pallas_call(
        _ln_kernel,
        out_shape=jax.ShapeDtypeStruct((M, E), jnp.float32),
        grid=(M // bm,),
        in_specs=[pl.BlockSpec((bm, E), lambda i: (i, 0)),
                  pl.BlockSpec((1, E), lambda i: (0, 0)),
                  pl.BlockSpec((1, E), lambda i: (0, 0))],
        out_specs=pl.BlockSpec((bm, E), lambda i: (i, 0)),
        compiler_params=pltpu.CompilerParams(
            dimension_semantics=("parallel",),
            vmem_limit_bytes=_VMEM_LIMIT),
    )(x2d, gamma.reshape(1, E), beta.reshape(1, E))


# ---------------------------------------------------------------------------
# Module glue (reshapes / parameter plumbing in plain JAX, fused under jit)
# ---------------------------------------------------------------------------

def decoder_layer(xb, kh, vh, p, nhead, query_pos_b):
    # xb: (B, Lq, E) batch-first internal layout; kh/vh: (B, H, Lk, Dh) for this layer.
    B, Lq, E = xb.shape
    Dh = E // nhead
    qb = xb if query_pos_b is None else xb + query_pos_b
    qp = linear(qb.reshape(B * Lq, E), p["wq"], p["bq"])              # (B*Lq, E)
    qh = qp.reshape(B, Lq, nhead, Dh).transpose(0, 2, 1, 3)           # (B, H, Lq, Dh)
    # cross-attention + fused out-proj + residual + norm1
    yb = mha_ln(qh, kh, vh, p["wo"], p["bo"], xb, p["g1"], p["be1"],
                1.0 / math.sqrt(Dh))                                  # (B, Lq, E)
    # fused FFN + residual + norm2 (hidden activation never written to HBM)
    y2d = ffn_ln(yb.reshape(B * Lq, E), p["w1"], p["b1"], p["w2"], p["b2"],
                 p["g2"], p["be2"])
    return y2d.reshape(B, Lq, E)


def _decoder_forward(x, memory, pos, query, params, nhead):
    # return_intermediate=False path of the PyTorch module.
    Lq, B, E = x.shape
    Lk = memory.shape[0]
    L = len(params["layers"])
    Dh = E // nhead

    # Loop-invariant K/V projections for ALL layers hoisted into two wide matmuls.
    k_mem = memory if pos is None else memory + pos
    k_all = linear(k_mem.reshape(Lk * B, E), params["wk_all"], params["bk_all"])
    v_all = linear(memory.reshape(Lk * B, E), params["wv_all"], params["bv_all"])
    k_all = k_all.reshape(Lk, B, L, nhead, Dh).transpose(2, 1, 3, 0, 4)  # (L,B,H,Lk,Dh)
    v_all = v_all.reshape(Lk, B, L, nhead, Dh).transpose(2, 1, 3, 0, 4)

    xb = x.transpose(1, 0, 2)                                            # (B, Lq, E)
    query_b = None if query is None else query.transpose(1, 0, 2)
    yb = xb
    for li, p in enumerate(params["layers"]):
        yb = decoder_layer(yb, k_all[li], v_all[li], p, nhead, query_b)

    y2d = layernorm(yb.reshape(B * Lq, E), params["gf"], params["bf"])
    return y2d.reshape(B, Lq, E).transpose(1, 0, 2)[None]                # torch unsqueeze(0)


# ---------------------------------------------------------------------------
# Deterministic parameter init (weights pre-transposed to (in, out) and stored bf16)
# ---------------------------------------------------------------------------

def init_params(key, emb_dim, nhead, num_layers, dim_forward=2048):
    def dense_t(k, n_in, n_out):
        # torch Linear weight (n_out, n_in) stored pre-transposed as (n_in, n_out), bf16.
        return (0.02 * jax.random.normal(k, (n_in, n_out), jnp.float32)).astype(jnp.bfloat16)

    layers, wk_l, wv_l = [], [], []
    for i in range(num_layers):
        ks = jax.random.split(jax.random.fold_in(key, i), 6)
        wk_l.append(dense_t(ks[1], emb_dim, emb_dim))
        wv_l.append(dense_t(ks[2], emb_dim, emb_dim))
        layers.append(dict(
            wq=dense_t(ks[0], emb_dim, emb_dim), bq=jnp.zeros((emb_dim,), jnp.float32),
            wo=dense_t(ks[3], emb_dim, emb_dim),      # concat-heads W_o^T : (E, E)
            bo=jnp.zeros((emb_dim,), jnp.float32),
            w1=dense_t(ks[4], emb_dim, dim_forward), b1=jnp.zeros((dim_forward,), jnp.float32),
            w2=dense_t(ks[5], dim_forward, emb_dim), b2=jnp.zeros((emb_dim,), jnp.float32),
            g1=jnp.ones((emb_dim,), jnp.float32), be1=jnp.zeros((emb_dim,), jnp.float32),
            g2=jnp.ones((emb_dim,), jnp.float32), be2=jnp.zeros((emb_dim,), jnp.float32),
        ))
    return dict(
        layers=layers,
        wk_all=jnp.concatenate(wk_l, axis=1),                 # (E, L*E) bf16
        bk_all=jnp.zeros((num_layers * emb_dim,), jnp.float32),
        wv_all=jnp.concatenate(wv_l, axis=1),                 # (E, L*E) bf16
        bv_all=jnp.zeros((num_layers * emb_dim,), jnp.float32),
        gf=jnp.ones((emb_dim,), jnp.float32),
        bf=jnp.zeros((emb_dim,), jnp.float32))


if __name__ == "__main__":
    emb_dim, nhead, num_layers = 32, 4, 2
    Lq, Lk, B = 8, 16, 2

    key = jax.random.PRNGKey(0)
    kx, km, kp, kq, kw = jax.random.split(key, 5)
    x = jax.random.normal(kx, (Lq, B, emb_dim), jnp.float32)
    memory = jax.random.normal(km, (Lk, B, emb_dim), jnp.float32)
    pos = jax.random.normal(kp, (Lk, B, emb_dim), jnp.float32)
    query = jax.random.normal(kq, (Lq, B, emb_dim), jnp.float32)

    params = init_params(kw, emb_dim, nhead, num_layers)

    transformer_decoder = jax.jit(functools.partial(_decoder_forward, nhead=nhead))
    out = transformer_decoder(x, memory, pos, query, params)
    out = jax.block_until_ready(out)
    assert out.shape == (1, Lq, B, emb_dim), out.shape
    assert bool(jnp.all(jnp.isfinite(out)))
    # TODO(synk): attn_mask / key_padding_mask paths are unused (None) in this forward and not implemented.
    print("KERNEL_OK")
</pallas_src>

<mosaic_0001>
module attributes {stable_mosaic.version = 11 : i64} {
  func.func @_matmul_kernel(%arg0: i32, %arg1: i32, %arg2: i32, %arg3: memref<16x32xf32, #tpu.memory_space<vmem>>, %arg4: memref<32x32xbf16, #tpu.memory_space<vmem>>, %arg5: memref<1x32xf32, #tpu.memory_space<vmem>>, %arg6: memref<16x32xf32, #tpu.memory_space<vmem>>, %arg7: memref<16x32xf32, #tpu.memory_space<vmem>>) attributes {dimension_semantics = [#tpu.dimension_semantics<parallel>, #tpu.dimension_semantics<parallel>, #tpu.dimension_semantics<arbitrary>], iteration_bounds = array<i64: 1, 1, 1>, scalar_prefetch = 0 : i64, scratch_operands = 1 : i64, tpu.core_type = #tpu.core_type<tc>, window_params = [{transform_indices = @transform_0, window_bounds = array<i64: 16, 32>}, {transform_indices = @transform_1, window_bounds = array<i64: 32, 32>}, {transform_indices = @transform_2, window_bounds = array<i64: 1, 32>}, {transform_indices = @transform_3, window_bounds = array<i64: 16, 32>}]} {
    %c0_i32 = arith.constant 0 : i32
    %0 = arith.cmpi eq, %arg2, %c0_i32 : i32
    %1 = arith.extui %0 : i1 to i32
    %c0_i32_0 = arith.constant 0 : i32
    %2 = arith.cmpi ne, %1, %c0_i32_0 : i32
    scf.if %2 {
      %cst_10 = arith.constant 0.000000e+00 : f32
      %13 = vector.broadcast %cst_10 : f32 to vector<16x32xf32>
      %c0_11 = arith.constant 0 : index
      %c0_12 = arith.constant 0 : index
      %14 = vector.load %arg7[%c0_11, %c0_12] : memref<16x32xf32, #tpu.memory_space<vmem>>, vector<16x32xf32>
      tpu.vector_store %arg7[%c0_11, %c0_12], %13 {strides = array<i32>} : memref<16x32xf32, #tpu.memory_space<vmem>>, vector<16x32xf32>,
    } else {
    }
    %c0 = arith.constant 0 : index
    %c0_1 = arith.constant 0 : index
    %3 = vector.load %arg7[%c0, %c0_1] : memref<16x32xf32, #tpu.memory_space<vmem>>, vector<16x32xf32>
    %c0_2 = arith.constant 0 : index
    %c0_3 = arith.constant 0 : index
    %4 = vector.load %arg3[%c0_2, %c0_3] : memref<16x32xf32, #tpu.memory_space<vmem>>, vector<16x32xf32>
    %5 = arith.truncf %4 : vector<16x32xf32> to vector<16x32xbf16>
    %c0_4 = arith.constant 0 : index
    %c0_5 = arith.constant 0 : index
    %6 = vector.load %arg4[%c0_4, %c0_5] : memref<32x32xbf16, #tpu.memory_space<vmem>>, vector<32x32xbf16>
    %cst = arith.constant dense<0.000000e+00> : vector<16x32xf32>
    %7 = tpu.matmul %5, %6, %cst {dimension_numbers = #tpu.dot_dimension_numbers<[1], [0], [0], [1], [0, 0, 1, 1], [], []>} : vector<16x32xbf16>, vector<32x32xbf16>, vector<16x32xf32> -> vector<16x32xf32>
    %8 = arith.addf %3, %7 : vector<16x32xf32>
    %c0_6 = arith.constant 0 : index
    %c0_7 = arith.constant 0 : index
    %9 = vector.load %arg7[%c0_6, %c0_7] : memref<16x32xf32, #tpu.memory_space<vmem>>, vector<16x32xf32>
    tpu.vector_store %arg7[%c0_6, %c0_7], %8 {strides = array<i32>} : memref<16x32xf32, #tpu.memory_space<vmem>>, vector<16x32xf32>,
    %c0_i32_8 = arith.constant 0 : i32
    %10 = arith.cmpi eq, %arg2, %c0_i32_8 : i32
    %11 = arith.extui %10 : i1 to i32
    %c0_i32_9 = arith.constant 0 : i32
    %12 = arith.cmpi ne, %11, %c0_i32_9 : i32
    scf.if %12 {
      %c0_10 = arith.constant 0 : index
      %c0_11 = arith.constant 0 : index
      %13 = vector.load %arg7[%c0_10, %c0_11] : memref<16x32xf32, #tpu.memory_space<vmem>>, vector<16x32xf32>
      %c0_12 = arith.constant 0 : index
      %c0_13 = arith.constant 0 : index
      %14 = vector.load %arg5[%c0_12, %c0_13] : memref<1x32xf32, #tpu.memory_space<vmem>>, vector<1x32xf32>
      %15 = vector.broadcast %14 : vector<1x32xf32> to vector<16x32xf32>
      %16 = arith.addf %13, %15 : vector<16x32xf32>
      %c0_14 = arith.constant 0 : index
      %c0_15 = arith.constant 0 : index
      %17 = vector.load %arg6[%c0_14, %c0_15] : memref<16x32xf32, #tpu.memory_space<vmem>>, vector<16x32xf32>
      tpu.vector_store %arg6[%c0_14, %c0_15], %16 {strides = array<i32>} : memref<16x32xf32, #tpu.memory_space<vmem>>, vector<16x32xf32>,
    } else {
    }
    return
  }
  func.func @transform_0(%arg0: i32, %arg1: i32, %arg2: i32) -> (i32, i32) {
    %c0_i32 = arith.constant 0 : i32
    return %arg0, %arg2 : i32, i32
  }
  func.func @transform_1(%arg0: i32, %arg1: i32, %arg2: i32) -> (i32, i32) {
    %c0_i32 = arith.constant 0 : i32
    return %arg2, %arg1 : i32, i32
  }
  func.func @transform_2(%arg0: i32, %arg1: i32, %arg2: i32) -> (i32, i32) {
    %c0_i32 = arith.constant 0 : i32
    %c0_i32_0 = arith.constant 0 : i32
    return %c0_i32, %arg1 : i32, i32
  }
  func.func @transform_3(%arg0: i32, %arg1: i32, %arg2: i32) -> (i32, i32) {
    %c0_i32 = arith.constant 0 : i32
    return %arg0, %arg1 : i32, i32
  }
}

module attributes {stable_mosaic.version = 11 : i64} {
  func.func @_matmul_kernel(%arg0: i32, %arg1: i32, %arg2: i32, %arg3: memref<32x32xf32, #tpu.memory_space<vmem>>, %arg4: memref<32x64xbf16, #tpu.memory_space<vmem>>, %arg5: memref<1x64xf32, #tpu.memory_space<vmem>>, %arg6: memref<32x64xf32, #tpu.memory_space<vmem>>, %arg7: memref<32x64xf32, #tpu.memory_space<vmem>>) attributes {dimension_semantics = [#tpu.dimension_semantics<parallel>, #tpu.dimension_semantics<parallel>, #tpu.dimension_semantics<arbitrary>], iteration_bounds = array<i64: 1, 1, 1>, scalar_prefetch = 0 : i64, scratch_operands = 1 : i64, tpu.core_type = #tpu.core_type<tc>, window_params = [{transform_indices = @transform_0, window_bounds = array<i64: 32, 32>}, {transform_indices = @transform_1, window_bounds = array<i64: 32, 64>}, {transform_indices = @transform_2, window_bounds = array<i64: 1, 64>}, {transform_indices = @transform_3, window_bounds = array<i64: 32, 64>}]} {
    %c0_i32 = arith.constant 0 : i32
    %0 = arith.cmpi eq, %arg2, %c0_i32 : i32
    %1 = arith.extui %0 : i1 to i32
    %c0_i32_0 = arith.constant 0 : i32
    %2 = arith.cmpi ne, %1, %c0_i32_0 : i32
    scf.if %2 {
      %cst_10 = arith.constant 0.000000e+00 : f32
      %13 = vector.broadcast %cst_10 : f32 to vector<32x64xf32>
      %c0_11 = arith.constant 0 : index
      %c0_12 = arith.constant 0 : index
      %14 = vector.load %arg7[%c0_11, %c0_12] : memref<32x64xf32, #tpu.memory_space<vmem>>, vector<32x64xf32>
      tpu.vector_store %arg7[%c0_11, %c0_12], %13 {strides = array<i32>} : memref<32x64xf32, #tpu.memory_space<vmem>>, vector<32x64xf32>,
    } else {
    }
    %c0 = arith.constant 0 : index
    %c0_1 = arith.constant 0 : index
    %3 = vector.load %arg7[%c0, %c0_1] : memref<32x64xf32, #tpu.memory_space<vmem>>, vector<32x64xf32>
    %c0_2 = arith.constant 0 : index
    %c0_3 = arith.constant 0 : index
    %4 = vector.load %arg3[%c0_2, %c0_3] : memref<32x32xf32, #tpu.memory_space<vmem>>, vector<32x32xf32>
    %5 = arith.truncf %4 : vector<32x32xf32> to vector<32x32xbf16>
    %c0_4 = arith.constant 0 : index
    %c0_5 = arith.constant 0 : index
    %6 = vector.load %arg4[%c0_4, %c0_5] : memref<32x64xbf16, #tpu.memory_space<vmem>>, vector<32x64xbf16>
    %cst = arith.constant dense<0.000000e+00> : vector<32x64xf32>
    %7 = tpu.matmul %5, %6, %cst {dimension_numbers = #tpu.dot_dimension_numbers<[1], [0], [0], [1], [0, 0, 1, 1], [], []>} : vector<32x32xbf16>, vector<32x64xbf16>, vector<32x64xf32> -> vector<32x64xf32>
    %8 = arith.addf %3, %7 : vector<32x64xf32>
    %c0_6 = arith.constant 0 : index
    %c0_7 = arith.constant 0 : index
    %9 = vector.load %arg7[%c0_6, %c0_7] : memref<32x64xf32, #tpu.memory_space<vmem>>, vector<32x64xf32>
    tpu.vector_store %arg7[%c0_6, %c0_7], %8 {strides = array<i32>} : memref<32x64xf32, #tpu.memory_space<vmem>>, vector<32x64xf32>,
    %c0_i32_8 = arith.constant 0 : i32
    %10 = arith.cmpi eq, %arg2, %c0_i32_8 : i32
    %11 = arith.extui %10 : i1 to i32
    %c0_i32_9 = arith.constant 0 : i32
    %12 = arith.cmpi ne, %11, %c0_i32_9 : i32
    scf.if %12 {
      %c0_10 = arith.constant 0 : index
      %c0_11 = arith.constant 0 : index
      %13 = vector.load %arg7[%c0_10, %c0_11] : memref<32x64xf32, #tpu.memory_space<vmem>>, vector<32x64xf32>
      %c0_12 = arith.constant 0 : index
      %c0_13 = arith.constant 0 : index
      %14 = vector.load %arg5[%c0_12, %c0_13] : memref<1x64xf32, #tpu.memory_space<vmem>>, vector<1x64xf32>
      %15 = vector.broadcast %14 : vector<1x64xf32> to vector<32x64xf32>
      %16 = arith.addf %13, %15 : vector<32x64xf32>
      %c0_14 = arith.constant 0 : index
      %c0_15 = arith.constant 0 : index
      %17 = vector.load %arg6[%c0_14, %c0_15] : memref<32x64xf32, #tpu.memory_space<vmem>>, vector<32x64xf32>
      tpu.vector_store %arg6[%c0_14, %c0_15], %16 {strides = array<i32>} : memref<32x64xf32, #tpu.memory_space<vmem>>, vector<32x64xf32>,
    } else {
    }
    return
  }
  func.func @transform_0(%arg0: i32, %arg1: i32, %arg2: i32) -> (i32, i32) {
    %c0_i32 = arith.constant 0 : i32
    return %arg0, %arg2 : i32, i32
  }
  func.func @transform_1(%arg0: i32, %arg1: i32, %arg2: i32) -> (i32, i32) {
    %c0_i32 = arith.constant 0 : i32
    return %arg2, %arg1 : i32, i32
  }
  func.func @transform_2(%arg0: i32, %arg1: i32, %arg2: i32) -> (i32, i32) {
    %c0_i32 = arith.constant 0 : i32
    %c0_i32_0 = arith.constant 0 : i32
    return %c0_i32, %arg1 : i32, i32
  }
  func.func @transform_3(%arg0: i32, %arg1: i32, %arg2: i32) -> (i32, i32) {
    %c0_i32 = arith.constant 0 : i32
    return %arg0, %arg1 : i32, i32
  }
}

module attributes {stable_mosaic.version = 11 : i64} {
  func.func @_mha_ln_kernel(%arg0: i32, %arg1: i32, %arg2: i32, %arg3: memref<1x4x8x8xf32, #tpu.memory_space<vmem>>, %arg4: memref<1x4x16x8xf32, #tpu.memory_space<vmem>>, %arg5: memref<1x4x16x8xf32, #tpu.memory_space<vmem>>, %arg6: memref<32x32xbf16, #tpu.memory_space<vmem>>, %arg7: memref<1x32xf32, #tpu.memory_space<vmem>>, %arg8: memref<1x8x32xf32, #tpu.memory_space<vmem>>, %arg9: memref<1x32xf32, #tpu.memory_space<vmem>>, %arg10: memref<1x32xf32, #tpu.memory_space<vmem>>, %arg11: memref<1x8x32xf32, #tpu.memory_space<vmem>>, %arg12: memref<4x8x1xf32, #tpu.memory_space<vmem>>, %arg13: memref<4x8x1xf32, #tpu.memory_space<vmem>>, %arg14: memref<4x8x8xf32, #tpu.memory_space<vmem>>, %arg15: memref<8x32xf32, #tpu.memory_space<vmem>>) attributes {dimension_semantics = [#tpu.dimension_semantics<parallel>, #tpu.dimension_semantics<parallel>, #tpu.dimension_semantics<arbitrary>], iteration_bounds = array<i64: 2, 1, 1>, scalar_prefetch = 0 : i64, scratch_operands = 4 : i64, tpu.core_type = #tpu.core_type<tc>, window_params = [{transform_indices = @transform_0, window_bounds = array<i64: 1, 4, 8, 8>}, {transform_indices = @transform_1, window_bounds = array<i64: 1, 4, 16, 8>}, {transform_indices = @transform_2, window_bounds = array<i64: 1, 4, 16, 8>}, {pipeline_mode = #tpu.pipeline_mode<synchronous>, transform_indices = @transform_3, window_bounds = array<i64: 32, 32>}, {pipeline_mode = #tpu.pipeline_mode<synchronous>, transform_indices = @transform_4, window_bounds = array<i64: 1, 32>}, {transform_indices = @transform_5, window_bounds = array<i64: 1, 8, 32>}, {pipeline_mode = #tpu.pipeline_mode<synchronous>, transform_indices = @transform_6, window_bounds = array<i64: 1, 32>}, {pipeline_mode = #tpu.pipeline_mode<synchronous>, transform_indices = @transform_7, window_bounds = array<i64: 1, 32>}, {transform_indices = @transform_8, window_bounds = array<i64: 1, 8, 32>}]} {
    %c0_i32 = arith.constant 0 : i32
    %0 = arith.cmpi eq, %arg2, %c0_i32 : i32
    %1 = arith.extui %0 : i1 to i32
    %c0_i32_0 = arith.constant 0 : i32
    %2 = arith.cmpi ne, %1, %c0_i32_0 : i32
    scf.if %2 {
      %cst_36 = arith.constant 0xFF800000 : f32
      %41 = vector.broadcast %cst_36 : f32 to vector<4x8x1xf32>
      %c0_37 = arith.constant 0 : index
      %c0_38 = arith.constant 0 : index
      %c0_39 = arith.constant 0 : index
      %42 = vector.load %arg12[%c0_37, %c0_38, %c0_39] : memref<4x8x1xf32, #tpu.memory_space<vmem>>, vector<4x8x1xf32>
      tpu.vector_store %arg12[%c0_37, %c0_38, %c0_39], %41 {strides = array<i32>} : memref<4x8x1xf32, #tpu.memory_space<vmem>>, vector<4x8x1xf32>,
      %cst_40 = arith.constant 0.000000e+00 : f32
      %43 = vector.broadcast %cst_40 : f32 to vector<4x8x1xf32>
      %c0_41 = arith.constant 0 : index
      %c0_42 = arith.constant 0 : index
      %c0_43 = arith.constant 0 : index
      %44 = vector.load %arg13[%c0_41, %c0_42, %c0_43] : memref<4x8x1xf32, #tpu.memory_space<vmem>>, vector<4x8x1xf32>
      tpu.vector_store %arg13[%c0_41, %c0_42, %c0_43], %43 {strides = array<i32>} : memref<4x8x1xf32, #tpu.memory_space<vmem>>, vector<4x8x1xf32>,
      %cst_44 = arith.constant 0.000000e+00 : f32
      %45 = vector.broadcast %cst_44 : f32 to vector<4x8x8xf32>
      %c0_45 = arith.constant 0 : index
      %c0_46 = arith.constant 0 : index
      %c0_47 = arith.constant 0 : index
      %46 = vector.load %arg14[%c0_45, %c0_46, %c0_47] : memref<4x8x8xf32, #tpu.memory_space<vmem>>, vector<4x8x8xf32>
      tpu.vector_store %arg14[%c0_45, %c0_46, %c0_47], %45 {strides = array<i32>} : memref<4x8x8xf32, #tpu.memory_space<vmem>>, vector<4x8x8xf32>,
    } else {
    }
    %c0 = arith.constant 0 : index
    %c0_1 = arith.constant 0 : index
    %c0_2 = arith.constant 0 : index
    %c0_3 = arith.constant 0 : index
    %3 = vector.load %arg3[%c0, %c0_1, %c0_2, %c0_3] : memref<1x4x8x8xf32, #tpu.memory_space<vmem>>, vector<1x4x8x8xf32>
    %4 = vector.shape_cast %3 : vector<1x4x8x8xf32> to vector<4x8x8xf32>
    %cst = arith.constant 0.353553385 : f32
    %5 = vector.broadcast %cst : f32 to vector<4x8x8xf32>
    %6 = arith.mulf %4, %5 : vector<4x8x8xf32>
    %7 = arith.truncf %6 : vector<4x8x8xf32> to vector<4x8x8xbf16>
    %c0_4 = arith.constant 0 : index
    %c0_5 = arith.constant 0 : index
    %c0_6 = arith.constant 0 : index
    %c0_7 = arith.constant 0 : index
    %8 = vector.load %arg4[%c0_4, %c0_5, %c0_6, %c0_7] : memref<1x4x16x8xf32, #tpu.memory_space<vmem>>, vector<1x4x16x8xf32>
    %9 = vector.shape_cast %8 : vector<1x4x16x8xf32> to vector<4x16x8xf32>
    %10 = arith.truncf %9 : vector<4x16x8xf32> to vector<4x16x8xbf16>
    %c0_8 = arith.constant 0 : index
    %c0_9 = arith.constant 0 : index
    %c0_10 = arith.constant 0 : index
    %c0_11 = arith.constant 0 : index
    %11 = vector.load %arg5[%c0_8, %c0_9, %c0_10, %c0_11] : memref<1x4x16x8xf32, #tpu.memory_space<vmem>>, vector<1x4x16x8xf32>
    %12 = vector.shape_cast %11 : vector<1x4x16x8xf32> to vector<4x16x8xf32>
    %13 = arith.truncf %12 : vector<4x16x8xf32> to vector<4x16x8xbf16>
    "tpu.trace_start"() <{level = 10 : i32, message = "hqd,hkd->hqk"}> : () -> ()
    %cst_12 = arith.constant dense<0.000000e+00> : vector<4x8x16xf32>
    %14 = tpu.matmul %7, %10, %cst_12 {dimension_numbers = #tpu.dot_dimension_numbers<[2], [2], [1], [1], [0, 0, 0, 1, 1, 1], [0], [0]>} : vector<4x8x8xbf16>, vector<4x16x8xbf16>, vector<4x8x16xf32> -> vector<4x8x16xf32>
    "tpu.trace_stop"() : () -> ()
    %c0_13 = arith.constant 0 : index
    %c0_14 = arith.constant 0 : index
    %c0_15 = arith.constant 0 : index
    %15 = vector.load %arg12[%c0_13, %c0_14, %c0_15] : memref<4x8x1xf32, #tpu.memory_space<vmem>>, vector<4x8x1xf32>
    %cst_16 = arith.constant dense<0xFF800000> : vector<4x8xf32>
    %16 = vector.multi_reduction <maximumf>, %14, %cst_16 [2] : vector<4x8x16xf32> to vector<4x8xf32>
    %17 = vector.shape_cast %16 : vector<4x8xf32> to vector<4x8x1xf32>
    %18 = arith.maximumf %15, %17 : vector<4x8x1xf32>
    %19 = arith.subf %15, %18 : vector<4x8x1xf32>
    %20 = math.exp %19 : vector<4x8x1xf32>
    %21 = vector.broadcast %18 : vector<4x8x1xf32> to vector<4x8x16xf32>
    %22 = arith.subf %14, %21 : vector<4x8x16xf32>
    %23 = math.exp %22 : vector<4x8x16xf32>
    %c0_17 = arith.constant 0 : index
    %c0_18 = arith.constant 0 : index
    %c0_19 = arith.constant 0 : index
    %24 = vector.load %arg13[%c0_17, %c0_18, %c0_19] : memref<4x8x1xf32, #tpu.memory_space<vmem>>, vector<4x8x1xf32>
    %25 = arith.mulf %20, %24 : vector<4x8x1xf32>
    %cst_20 = arith.constant dense<0.000000e+00> : vector<4x8xf32>
    %26 = vector.multi_reduction <add>, %23, %cst_20 [2] : vector<4x8x16xf32> to vector<4x8xf32>
    %27 = vector.shape_cast %26 : vector<4x8xf32> to vector<4x8x1xf32>
    %28 = arith.addf %25, %27 : vector<4x8x1xf32>
    %c0_21 = arith.constant 0 : index
    %c0_22 = arith.constant 0 : index
    %c0_23 = arith.constant 0 : index
    %29 = vector.load %arg13[%c0_21, %c0_22, %c0_23] : memref<4x8x1xf32, #tpu.memory_space<vmem>>, vector<4x8x1xf32>
    tpu.vector_store %arg13[%c0_21, %c0_22, %c0_23], %28 {strides = array<i32>} : memref<4x8x1xf32, #tpu.memory_space<vmem>>, vector<4x8x1xf32>,
    %c0_24 = arith.constant 0 : index
    %c0_25 = arith.constant 0 : index
    %c0_26 = arith.constant 0 : index
    %30 = vector.load %arg14[%c0_24, %c0_25, %c0_26] : memref<4x8x8xf32, #tpu.memory_space<vmem>>, vector<4x8x8xf32>
    %31 = vector.broadcast %20 : vector<4x8x1xf32> to vector<4x8x8xf32>
    %32 = arith.mulf %31, %30 : vector<4x8x8xf32>
    %33 = arith.truncf %23 : vector<4x8x16xf32> to vector<4x8x16xbf16>
    "tpu.trace_start"() <{level = 10 : i32, message = "hqk,hkd->hqd"}> : () -> ()
    %cst_27 = arith.constant dense<0.000000e+00> : vector<4x8x8xf32>
    %34 = tpu.matmul %33, %13, %cst_27 {dimension_numbers = #tpu.dot_dimension_numbers<[2], [1], [1], [2], [0, 0, 0, 1, 1, 2], [0], [0]>} : vector<4x8x16xbf16>, vector<4x16x8xbf16>, vector<4x8x8xf32> -> vector<4x8x8xf32>
    "tpu.trace_stop"() : () -> ()
    %35 = arith.addf %32, %34 : vector<4x8x8xf32>
    %c0_28 = arith.constant 0 : index
    %c0_29 = arith.constant 0 : index
    %c0_30 = arith.constant 0 : index
    %36 = vector.load %arg14[%c0_28, %c0_29, %c0_30] : memref<4x8x8xf32, #tpu.memory_space<vmem>>, vector<4x8x8xf32>
    tpu.vector_store %arg14[%c0_28, %c0_29, %c0_30], %35 {strides = array<i32>} : memref<4x8x8xf32, #tpu.memory_space<vmem>>, vector<4x8x8xf32>,
    %c0_31 = arith.constant 0 : index
    %c0_32 = arith.constant 0 : index
    %c0_33 = arith.constant 0 : index
    %37 = vector.load %arg12[%c0_31, %c0_32, %c0_33] : memref<4x8x1xf32, #tpu.memory_space<vmem>>, vector<4x8x1xf32>
    tpu.vector_store %arg12[%c0_31, %c0_32, %c0_33], %18 {strides = array<i32>} : memref<4x8x1xf32, #tpu.memory_space<vmem>>, vector<4x8x1xf32>,
    %c0_i32_34 = arith.constant 0 : i32
    %38 = arith.cmpi eq, %arg2, %c0_i32_34 : i32
    %39 = arith.extui %38 : i1 to i32
    %c0_i32_35 = arith.constant 0 : i32
    %40 = arith.cmpi ne, %39, %c0_i32_35 : i32
    scf.if %40 {
      %c0_36 = arith.constant 0 : index
      %c0_37 = arith.constant 0 : index
      %c0_38 = arith.constant 0 : index
      %41 = vector.load %arg14[%c0_36, %c0_37, %c0_38] : memref<4x8x8xf32, #tpu.memory_space<vmem>>, vector<4x8x8xf32>
      %c0_39 = arith.constant 0 : index
      %c0_40 = arith.constant 0 : index
      %c0_41 = arith.constant 0 : index
      %42 = vector.load %arg13[%c0_39, %c0_40, %c0_41] : memref<4x8x1xf32, #tpu.memory_space<vmem>>, vector<4x8x1xf32>
      %43 = vector.broadcast %42 : vector<4x8x1xf32> to vector<4x8x8xf32>
      %44 = arith.divf %41, %43 : vector<4x8x8xf32>
      %45 = vector.extract_strided_slice %44 {offsets = [0, 0, 0], sizes = [1, 8, 8], strides = [1, 1, 1]} : vector<4x8x8xf32> to vector<1x8x8xf32>
      %46 = vector.shape_cast %45 : vector<1x8x8xf32> to vector<8x8xf32>
      %c0_42 = arith.constant 0 : index
      %c0_43 = arith.constant 0 : index
      %47 = vector.load %arg15[%c0_42, %c0_43] : memref<8x32xf32, #tpu.memory_space<vmem>>, vector<8x8xf32>
      tpu.vector_store %arg15[%c0_42, %c0_43], %46 {strides = array<i32>} : memref<8x32xf32, #tpu.memory_space<vmem>>, vector<8x8xf32>,
      %48 = vector.extract_strided_slice %44 {offsets = [1, 0, 0], sizes = [1, 8, 8], strides = [1, 1, 1]} : vector<4x8x8xf32> to vector<1x8x8xf32>
      %49 = vector.shape_cast %48 : vector<1x8x8xf32> to vector<8x8xf32>
      %c0_44 = arith.constant 0 : index
      %c8 = arith.constant 8 : index
      %50 = vector.load %arg15[%c0_44, %c8] : memref<8x32xf32, #tpu.memory_space<vmem>>, vector<8x8xf32>
      tpu.vector_store %arg15[%c0_44, %c8], %49 {strides = array<i32>} : memref<8x32xf32, #tpu.memory_space<vmem>>, vector<8x8xf32>,
      %51 = vector.extract_strided_slice %44 {offsets = [2, 0, 0], sizes = [1, 8, 8], strides = [1, 1, 1]} : vector<4x8x8xf32> to vector<1x8x8xf32>
      %52 = vector.shape_cast %51 : vector<1x8x8xf32> to vector<8x8xf32>
      %c0_45 = arith.constant 0 : index
      %c16 = arith.constant 16 : index
      %53 = vector.load %arg15[%c0_45, %c16] : memref<8x32xf32, #tpu.memory_space<vmem>>, vector<8x8xf32>
      tpu.vector_store %arg15[%c0_45, %c16], %52 {strides = array<i32>} : memref<8x32xf32, #tpu.memory_space<vmem>>, vector<8x8xf32>,
      %54 = vector.extract_strided_slice %44 {offsets = [3, 0, 0], sizes = [1, 8, 8], strides = [1, 1, 1]} : vector<4x8x8xf32> to vector<1x8x8xf32>
      %55 = vector.shape_cast %54 : vector<1x8x8xf32> to vector<8x8xf32>
      %c0_46 = arith.constant 0 : index
      %c24 = arith.constant 24 : index
      %56 = vector.load %arg15[%c0_46, %c24] : memref<8x32xf32, #tpu.memory_space<vmem>>, vector<8x8xf32>
      tpu.vector_store %arg15[%c0_46, %c24], %55 {strides = array<i32>} : memref<8x32xf32, #tpu.memory_space<vmem>>, vector<8x8xf32>,
      %c0_47 = arith.constant 0 : index
      %c0_48 = arith.constant 0 : index
      %57 = vector.load %arg15[%c0_47, %c0_48] : memref<8x32xf32, #tpu.memory_space<vmem>>, vector<8x32xf32>
      %58 = arith.truncf %57 : vector<8x32xf32> to vector<8x32xbf16>
      %c0_49 = arith.constant 0 : index
      %c0_50 = arith.constant 0 : index
      %59 = vector.load %arg6[%c0_49, %c0_50] : memref<32x32xbf16, #tpu.memory_space<vmem>>, vector<32x32xbf16>
      %cst_51 = arith.constant dense<0.000000e+00> : vector<8x32xf32>
      %60 = tpu.matmul %58, %59, %cst_51 {dimension_numbers = #tpu.dot_dimension_numbers<[1], [0], [0], [1], [0, 0, 1, 1], [], []>} : vector<8x32xbf16>, vector<32x32xbf16>, vector<8x32xf32> -> vector<8x32xf32>
      %c0_52 = arith.constant 0 : index
      %c0_53 = arith.constant 0 : index
      %61 = vector.load %arg7[%c0_52, %c0_53] : memref<1x32xf32, #tpu.memory_space<vmem>>, vector<1x32xf32>
      %62 = vector.broadcast %61 : vector<1x32xf32> to vector<8x32xf32>
      %63 = arith.addf %60, %62 : vector<8x32xf32>
      %c0_54 = arith.constant 0 : index
      %c0_55 = arith.constant 0 : index
      %c0_56 = arith.constant 0 : index
      %64 = vector.load %arg8[%c0_54, %c0_55, %c0_56] : memref<1x8x32xf32, #tpu.memory_space<vmem>>, vector<1x8x32xf32>
      %65 = vector.shape_cast %64 : vector<1x8x32xf32> to vector<8x32xf32>
      %66 = arith.addf %65, %63 : vector<8x32xf32>
      %cst_57 = arith.constant dense<0.000000e+00> : vector<8xf32>
      %67 = vector.multi_reduction <add>, %66, %cst_57 [1] : vector<8x32xf32> to vector<8xf32>
      %68 = vector.shape_cast %67 : vector<8xf32> to vector<8x1xf32>
      %cst_58 = arith.constant 3.200000e+01 : f32
      %69 = vector.broadcast %cst_58 : f32 to vector<8x1xf32>
      %70 = arith.divf %68, %69 : vector<8x1xf32>
      %71 = vector.broadcast %70 : vector<8x1xf32> to vector<8x32xf32>
      %72 = arith.subf %66, %71 : vector<8x32xf32>
      %73 = arith.mulf %72, %72 : vector<8x32xf32>
      %cst_59 = arith.constant dense<0.000000e+00> : vector<8xf32>
      %74 = vector.multi_reduction <add>, %73, %cst_59 [1] : vector<8x32xf32> to vector<8xf32>
      %75 = vector.shape_cast %74 : vector<8xf32> to vector<8x1xf32>
      %cst_60 = arith.constant 3.200000e+01 : f32
      %76 = vector.broadcast %cst_60 : f32 to vector<8x1xf32>
      %77 = arith.divf %75, %76 : vector<8x1xf32>
      %78 = vector.broadcast %70 : vector<8x1xf32> to vector<8x32xf32>
      %79 = arith.subf %66, %78 : vector<8x32xf32>
      %cst_61 = arith.constant 9.99999974E-6 : f32
      %80 = vector.broadcast %cst_61 : f32 to vector<8x1xf32>
      %81 = arith.addf %77, %80 : vector<8x1xf32>
      %82 = math.rsqrt %81 : vector<8x1xf32>
      %83 = vector.broadcast %82 : vector<8x1xf32> to vector<8x32xf32>
      %84 = arith.mulf %79, %83 : vector<8x32xf32>
      %c0_62 = arith.constant 0 : index
      %c0_63 = arith.constant 0 : index
      %85 = vector.load %arg9[%c0_62, %c0_63] : memref<1x32xf32, #tpu.memory_space<vmem>>, vector<1x32xf32>
      %86 = vector.broadcast %85 : vector<1x32xf32> to vector<8x32xf32>
      %87 = arith.mulf %84, %86 : vector<8x32xf32>
      %c0_64 = arith.constant 0 : index
      %c0_65 = arith.constant 0 : index
      %88 = vector.load %arg10[%c0_64, %c0_65] : memref<1x32xf32, #tpu.memory_space<vmem>>, vector<1x32xf32>
      %89 = vector.broadcast %88 : vector<1x32xf32> to vector<8x32xf32>
      %90 = arith.addf %87, %89 : vector<8x32xf32>
      %c0_66 = arith.constant 0 : index
      %c0_67 = arith.constant 0 : index
      %c0_68 = arith.constant 0 : index
      %91 = vector.load %arg11[%c0_66, %c0_67, %c0_68] : memref<1x8x32xf32, #tpu.memory_space<vmem>>, vector<1x8x32xf32>
      %92 = vector.shape_cast %91 : vector<1x8x32xf32> to vector<8x32xf32>
      %93 = vector.shape_cast %90 : vector<8x32xf32> to vector<1x8x32xf32>
      tpu.vector_store %arg11[%c0_66, %c0_67, %c0_68], %93 {strides = array<i32>} : memref<1x8x32xf32, #tpu.memory_space<vmem>>, vector<1x8x32xf32>,
    } else {
    }
    return
  }
  func.func @transform_0(%arg0: i32, %arg1: i32, %arg2: i32) -> (i32, i32, i32, i32) {
    %c0_i32 = arith.constant 0 : i32
    %c0_i32_0 = arith.constant 0 : i32
    %c0_i32_1 = arith.constant 0 : i32
    return %arg0, %c0_i32, %arg1, %c0_i32_0 : i32, i32, i32, i32
  }
  func.func @transform_1(%arg0: i32, %arg1: i32, %arg2: i32) -> (i32, i32, i32, i32) {
    %c0_i32 = arith.constant 0 : i32
    %c0_i32_0 = arith.constant 0 : i32
    %c0_i32_1 = arith.constant 0 : i32
    return %arg0, %c0_i32, %arg2, %c0_i32_0 : i32, i32, i32, i32
  }
  func.func @transform_2(%arg0: i32, %arg1: i32, %arg2: i32) -> (i32, i32, i32, i32) {
    %c0_i32 = arith.constant 0 : i32
    %c0_i32_0 = arith.constant 0 : i32
    %c0_i32_1 = arith.constant 0 : i32
    return %arg0, %c0_i32, %arg2, %c0_i32_0 : i32, i32, i32, i32
  }
  func.func @transform_3(%arg0: i32, %arg1: i32, %arg2: i32) -> (i32, i32) {
    %c0_i32 = arith.constant 0 : i32
    %c0_i32_0 = arith.constant 0 : i32
    %c0_i32_1 = arith.constant 0 : i32
    return %c0_i32, %c0_i32_0 : i32, i32
  }
  func.func @transform_4(%arg0: i32, %arg1: i32, %arg2: i32) -> (i32, i32) {
    %c0_i32 = arith.constant 0 : i32
    %c0_i32_0 = arith.constant 0 : i32
    %c0_i32_1 = arith.constant 0 : i32
    return %c0_i32, %c0_i32_0 : i32, i32
  }
  func.func @transform_5(%arg0: i32, %arg1: i32, %arg2: i32) -> (i32, i32, i32) {
    %c0_i32 = arith.constant 0 : i32
    %c0_i32_0 = arith.constant 0 : i32
    return %arg0, %arg1, %c0_i32 : i32, i32, i32
  }
  func.func @transform_6(%arg0: i32, %arg1: i32, %arg2: i32) -> (i32, i32) {
    %c0_i32 = arith.constant 0 : i32
    %c0_i32_0 = arith.constant 0 : i32
    %c0_i32_1 = arith.constant 0 : i32
    return %c0_i32, %c0_i32_0 : i32, i32
  }
  func.func @transform_7(%arg0: i32, %arg1: i32, %arg2: i32) -> (i32, i32) {
    %c0_i32 = arith.constant 0 : i32
    %c0_i32_0 = arith.constant 0 : i32
    %c0_i32_1 = arith.constant 0 : i32
    return %c0_i32, %c0_i32_0 : i32, i32
  }
  func.func @transform_8(%arg0: i32, %arg1: i32, %arg2: i32) -> (i32, i32, i32) {
    %c0_i32 = arith.constant 0 : i32
    %c0_i32_0 = arith.constant 0 : i32
    return %arg0, %arg1, %c0_i32 : i32, i32, i32
  }
}

module attributes {stable_mosaic.version = 11 : i64} {
  func.func @_ffn_ln_kernel(%arg0: i32, %arg1: memref<16x32xf32, #tpu.memory_space<vmem>>, %arg2: memref<32x2048xbf16, #tpu.memory_space<vmem>>, %arg3: memref<1x2048xf32, #tpu.memory_space<vmem>>, %arg4: memref<2048x32xbf16, #tpu.memory_space<vmem>>, %arg5: memref<1x32xf32, #tpu.memory_space<vmem>>, %arg6: memref<1x32xf32, #tpu.memory_space<vmem>>, %arg7: memref<1x32xf32, #tpu.memory_space<vmem>>, %arg8: memref<16x32xf32, #tpu.memory_space<vmem>>) attributes {dimension_semantics = [#tpu.dimension_semantics<parallel>], iteration_bounds = array<i64: 1>, scalar_prefetch = 0 : i64, scratch_operands = 0 : i64, tpu.core_type = #tpu.core_type<tc>, window_params = [{transform_indices = @transform_0, window_bounds = array<i64: 16, 32>}, {pipeline_mode = #tpu.pipeline_mode<synchronous>, transform_indices = @transform_1, window_bounds = array<i64: 32, 2048>}, {pipeline_mode = #tpu.pipeline_mode<synchronous>, transform_indices = @transform_2, window_bounds = array<i64: 1, 2048>}, {pipeline_mode = #tpu.pipeline_mode<synchronous>, transform_indices = @transform_3, window_bounds = array<i64: 2048, 32>}, {pipeline_mode = #tpu.pipeline_mode<synchronous>, transform_indices = @transform_4, window_bounds = array<i64: 1, 32>}, {pipeline_mode = #tpu.pipeline_mode<synchronous>, transform_indices = @transform_5, window_bounds = array<i64: 1, 32>}, {pipeline_mode = #tpu.pipeline_mode<synchronous>, transform_indices = @transform_6, window_bounds = array<i64: 1, 32>}, {transform_indices = @transform_7, window_bounds = array<i64: 16, 32>}]} {
    %c0 = arith.constant 0 : index
    %c0_0 = arith.constant 0 : index
    %0 = vector.load %arg1[%c0, %c0_0] : memref<16x32xf32, #tpu.memory_space<vmem>>, vector<16x32xf32>
    %1 = arith.truncf %0 : vector<16x32xf32> to vector<16x32xbf16>
    %c0_1 = arith.constant 0 : index
    %c0_2 = arith.constant 0 : index
    %2 = vector.load %arg2[%c0_1, %c0_2] : memref<32x2048xbf16, #tpu.memory_space<vmem>>, vector<32x2048xbf16>
    %cst = arith.constant dense<0.000000e+00> : vector<16x2048xf32>
    %3 = tpu.matmul %1, %2, %cst {dimension_numbers = #tpu.dot_dimension_numbers<[1], [0], [0], [1], [0, 0, 1, 1], [], []>} : vector<16x32xbf16>, vector<32x2048xbf16>, vector<16x2048xf32> -> vector<16x2048xf32>
    %c0_3 = arith.constant 0 : index
    %c0_4 = arith.constant 0 : index
    %4 = vector.load %arg3[%c0_3, %c0_4] : memref<1x2048xf32, #tpu.memory_space<vmem>>, vector<1x2048xf32>
    %5 = vector.broadcast %4 : vector<1x2048xf32> to vector<16x2048xf32>
    %6 = arith.addf %3, %5 : vector<16x2048xf32>
    %cst_5 = arith.constant 0.000000e+00 : f32
    %7 = vector.broadcast %cst_5 : f32 to vector<16x2048xf32>
    %8 = arith.maximumf %6, %7 : vector<16x2048xf32>
    %9 = arith.truncf %8 : vector<16x2048xf32> to vector<16x2048xbf16>
    %c0_6 = arith.constant 0 : index
    %c0_7 = arith.constant 0 : index
    %10 = vector.load %arg4[%c0_6, %c0_7] : memref<2048x32xbf16, #tpu.memory_space<vmem>>, vector<2048x32xbf16>
    %cst_8 = arith.constant dense<0.000000e+00> : vector<16x32xf32>
    %11 = tpu.matmul %9, %10, %cst_8 {dimension_numbers = #tpu.dot_dimension_numbers<[1], [0], [0], [1], [0, 0, 1, 1], [], []>} : vector<16x2048xbf16>, vector<2048x32xbf16>, vector<16x32xf32> -> vector<16x32xf32>
    %c0_9 = arith.constant 0 : index
    %c0_10 = arith.constant 0 : index
    %12 = vector.load %arg5[%c0_9, %c0_10] : memref<1x32xf32, #tpu.memory_space<vmem>>, vector<1x32xf32>
    %13 = vector.broadcast %12 : vector<1x32xf32> to vector<16x32xf32>
    %14 = arith.addf %11, %13 : vector<16x32xf32>
    %15 = arith.addf %0, %14 : vector<16x32xf32>
    %cst_11 = arith.constant dense<0.000000e+00> : vector<16xf32>
    %16 = vector.multi_reduction <add>, %15, %cst_11 [1] : vector<16x32xf32> to vector<16xf32>
    %17 = vector.shape_cast %16 : vector<16xf32> to vector<16x1xf32>
    %cst_12 = arith.constant 3.200000e+01 : f32
    %18 = vector.broadcast %cst_12 : f32 to vector<16x1xf32>
    %19 = arith.divf %17, %18 : vector<16x1xf32>
    %20 = vector.broadcast %19 : vector<16x1xf32> to vector<16x32xf32>
    %21 = arith.subf %15, %20 : vector<16x32xf32>
    %22 = arith.mulf %21, %21 : vector<16x32xf32>
    %cst_13 = arith.constant dense<0.000000e+00> : vector<16xf32>
    %23 = vector.multi_reduction <add>, %22, %cst_13 [1] : vector<16x32xf32> to vector<16xf32>
    %24 = vector.shape_cast %23 : vector<16xf32> to vector<16x1xf32>
    %cst_14 = arith.constant 3.200000e+01 : f32
    %25 = vector.broadcast %cst_14 : f32 to vector<16x1xf32>
    %26 = arith.divf %24, %25 : vector<16x1xf32>
    %27 = vector.broadcast %19 : vector<16x1xf32> to vector<16x32xf32>
    %28 = arith.subf %15, %27 : vector<16x32xf32>
    %cst_15 = arith.constant 9.99999974E-6 : f32
    %29 = vector.broadcast %cst_15 : f32 to vector<16x1xf32>
    %30 = arith.addf %26, %29 : vector<16x1xf32>
    %31 = math.rsqrt %30 : vector<16x1xf32>
    %32 = vector.broadcast %31 : vector<16x1xf32> to vector<16x32xf32>
    %33 = arith.mulf %28, %32 : vector<16x32xf32>
    %c0_16 = arith.constant 0 : index
    %c0_17 = arith.constant 0 : index
    %34 = vector.load %arg6[%c0_16, %c0_17] : memref<1x32xf32, #tpu.memory_space<vmem>>, vector<1x32xf32>
    %35 = vector.broadcast %34 : vector<1x32xf32> to vector<16x32xf32>
    %36 = arith.mulf %33, %35 : vector<16x32xf32>
    %c0_18 = arith.constant 0 : index
    %c0_19 = arith.constant 0 : index
    %37 = vector.load %arg7[%c0_18, %c0_19] : memref<1x32xf32, #tpu.memory_space<vmem>>, vector<1x32xf32>
    %38 = vector.broadcast %37 : vector<1x32xf32> to vector<16x32xf32>
    %39 = arith.addf %36, %38 : vector<16x32xf32>
    %c0_20 = arith.constant 0 : index
    %c0_21 = arith.constant 0 : index
    %40 = vector.load %arg8[%c0_20, %c0_21] : memref<16x32xf32, #tpu.memory_space<vmem>>, vector<16x32xf32>
    tpu.vector_store %arg8[%c0_20, %c0_21], %39 {strides = array<i32>} : memref<16x32xf32, #tpu.memory_space<vmem>>, vector<16x32xf32>,
    return
  }
  func.func @transform_0(%arg0: i32) -> (i32, i32) {
    %c0_i32 = arith.constant 0 : i32
    %c0_i32_0 = arith.constant 0 : i32
    return %arg0, %c0_i32 : i32, i32
  }
  func.func @transform_1(%arg0: i32) -> (i32, i32) {
    %c0_i32 = arith.constant 0 : i32
    %c0_i32_0 = arith.constant 0 : i32
    %c0_i32_1 = arith.constant 0 : i32
    return %c0_i32, %c0_i32_0 : i32, i32
  }
  func.func @transform_2(%arg0: i32) -> (i32, i32) {
    %c0_i32 = arith.constant 0 : i32
    %c0_i32_0 = arith.constant 0 : i32
    %c0_i32_1 = arith.constant 0 : i32
    return %c0_i32, %c0_i32_0 : i32, i32
  }
  func.func @transform_3(%arg0: i32) -> (i32, i32) {
    %c0_i32 = arith.constant 0 : i32
    %c0_i32_0 = arith.constant 0 : i32
    %c0_i32_1 = arith.constant 0 : i32
    return %c0_i32, %c0_i32_0 : i32, i32
  }
  func.func @transform_4(%arg0: i32) -> (i32, i32) {
    %c0_i32 = arith.constant 0 : i32
    %c0_i32_0 = arith.constant 0 : i32
    %c0_i32_1 = arith.constant 0 : i32
    return %c0_i32, %c0_i32_0 : i32, i32
  }
  func.func @transform_5(%arg0: i32) -> (i32, i32) {
    %c0_i32 = arith.constant 0 : i32
    %c0_i32_0 = arith.constant 0 : i32
    %c0_i32_1 = arith.constant 0 : i32
    return %c0_i32, %c0_i32_0 : i32, i32
  }
  func.func @transform_6(%arg0: i32) -> (i32, i32) {
    %c0_i32 = arith.constant 0 : i32
    %c0_i32_0 = arith.constant 0 : i32
    %c0_i32_1 = arith.constant 0 : i32
    return %c0_i32, %c0_i32_0 : i32, i32
  }
  func.func @transform_7(%arg0: i32) -> (i32, i32) {
    %c0_i32 = arith.constant 0 : i32
    %c0_i32_0 = arith.constant 0 : i32
    return %arg0, %c0_i32 : i32, i32
  }
}

module attributes {stable_mosaic.version = 11 : i64} {
  func.func @_ln_kernel(%arg0: i32, %arg1: memref<16x32xf32, #tpu.memory_space<vmem>>, %arg2: memref<1x32xf32, #tpu.memory_space<vmem>>, %arg3: memref<1x32xf32, #tpu.memory_space<vmem>>, %arg4: memref<16x32xf32, #tpu.memory_space<vmem>>) attributes {dimension_semantics = [#tpu.dimension_semantics<parallel>], iteration_bounds = array<i64: 1>, scalar_prefetch = 0 : i64, scratch_operands = 0 : i64, tpu.core_type = #tpu.core_type<tc>, window_params = [{transform_indices = @transform_0, window_bounds = array<i64: 16, 32>}, {pipeline_mode = #tpu.pipeline_mode<synchronous>, transform_indices = @transform_1, window_bounds = array<i64: 1, 32>}, {pipeline_mode = #tpu.pipeline_mode<synchronous>, transform_indices = @transform_2, window_bounds = array<i64: 1, 32>}, {transform_indices = @transform_3, window_bounds = array<i64: 16, 32>}]} {
    %c0 = arith.constant 0 : index
    %c0_0 = arith.constant 0 : index
    %0 = vector.load %arg1[%c0, %c0_0] : memref<16x32xf32, #tpu.memory_space<vmem>>, vector<16x32xf32>
    %cst = arith.constant dense<0.000000e+00> : vector<16xf32>
    %1 = vector.multi_reduction <add>, %0, %cst [1] : vector<16x32xf32> to vector<16xf32>
    %2 = vector.shape_cast %1 : vector<16xf32> to vector<16x1xf32>
    %cst_1 = arith.constant 3.200000e+01 : f32
    %3 = vector.broadcast %cst_1 : f32 to vector<16x1xf32>
    %4 = arith.divf %2, %3 : vector<16x1xf32>
    %5 = vector.broadcast %4 : vector<16x1xf32> to vector<16x32xf32>
    %6 = arith.subf %0, %5 : vector<16x32xf32>
    %7 = arith.mulf %6, %6 : vector<16x32xf32>
    %cst_2 = arith.constant dense<0.000000e+00> : vector<16xf32>
    %8 = vector.multi_reduction <add>, %7, %cst_2 [1] : vector<16x32xf32> to vector<16xf32>
    %9 = vector.shape_cast %8 : vector<16xf32> to vector<16x1xf32>
    %cst_3 = arith.constant 3.200000e+01 : f32
    %10 = vector.broadcast %cst_3 : f32 to vector<16x1xf32>
    %11 = arith.divf %9, %10 : vector<16x1xf32>
    %12 = vector.broadcast %4 : vector<16x1xf32> to vector<16x32xf32>
    %13 = arith.subf %0, %12 : vector<16x32xf32>
    %cst_4 = arith.constant 9.99999974E-6 : f32
    %14 = vector.broadcast %cst_4 : f32 to vector<16x1xf32>
    %15 = arith.addf %11, %14 : vector<16x1xf32>
    %16 = math.rsqrt %15 : vector<16x1xf32>
    %17 = vector.broadcast %16 : vector<16x1xf32> to vector<16x32xf32>
    %18 = arith.mulf %13, %17 : vector<16x32xf32>
    %c0_5 = arith.constant 0 : index
    %c0_6 = arith.constant 0 : index
    %19 = vector.load %arg2[%c0_5, %c0_6] : memref<1x32xf32, #tpu.memory_space<vmem>>, vector<1x32xf32>
    %20 = vector.broadcast %19 : vector<1x32xf32> to vector<16x32xf32>
    %21 = arith.mulf %18, %20 : vector<16x32xf32>
    %c0_7 = arith.constant 0 : index
    %c0_8 = arith.constant 0 : index
    %22 = vector.load %arg3[%c0_7, %c0_8] : memref<1x32xf32, #tpu.memory_space<vmem>>, vector<1x32xf32>
    %23 = vector.broadcast %22 : vector<1x32xf32> to vector<16x32xf32>
    %24 = arith.addf %21, %23 : vector<16x32xf32>
    %c0_9 = arith.constant 0 : index
    %c0_10 = arith.constant 0 : index
    %25 = vector.load %arg4[%c0_9, %c0_10] : memref<16x32xf32, #tpu.memory_space<vmem>>, vector<16x32xf32>
    tpu.vector_store %arg4[%c0_9, %c0_10], %24 {strides = array<i32>} : memref<16x32xf32, #tpu.memory_space<vmem>>, vector<16x32xf32>,
    return
  }
  func.func @transform_0(%arg0: i32) -> (i32, i32) {
    %c0_i32 = arith.constant 0 : i32
    %c0_i32_0 = arith.constant 0 : i32
    return %arg0, %c0_i32 : i32, i32
  }
  func.func @transform_1(%arg0: i32) -> (i32, i32) {
    %c0_i32 = arith.constant 0 : i32
    %c0_i32_0 = arith.constant 0 : i32
    %c0_i32_1 = arith.constant 0 : i32
    return %c0_i32, %c0_i32_0 : i32, i32
  }
  func.func @transform_2(%arg0: i32) -> (i32, i32) {
    %c0_i32 = arith.constant 0 : i32
    %c0_i32_0 = arith.constant 0 : i32
    %c0_i32_1 = arith.constant 0 : i32
    return %c0_i32, %c0_i32_0 : i32, i32
  }
  func.func @transform_3(%arg0: i32) -> (i32, i32) {
    %c0_i32 = arith.constant 0 : i32
    %c0_i32_0 = arith.constant 0 : i32
    return %arg0, %c0_i32 : i32, i32
  }
}

</mosaic_0001>

<bundles_post_ra>
// kernel: _decoder_forward.11
= control target key start
LH: loop header
LB: loop body
LE: loop exit
PB: predicated region body
PF: predicated region fallthrough
CT: control target
= control target key end

     0   :  { %vm19_vm0 = vcmask 261120   ;;  %v131_v0 = vmov 0.0   ;;  %vm132_vm1 = vmmov 0   ;;  %s181_s1 = inlined_call_operand.vmem [shape: bf16[32,32], index: 1, kind: input, shape index: {}]   ;;  %s182_s0 = inlined_call_operand.vmem [shape: f32[16,32], index: 0, kind: input, shape index: {}]   ;;  %s183_s2 = inlined_call_operand.vmem [shape: f32[1,32], index: 2, kind: input, shape index: {}]   ;;  %s184_s3 = inlined_call_operand.vmem [shape: f32[16,32], index: 3, kind: output, shape index: {}]  }
   0x1   :  { %119 = vmatprep.subr.bf16.mxu0 %v131_v0  ;;  %v129_v1 = vld [vmem:[%s181_s1 + $0x8] sm:$0xff]   ;;  %123 = vmatprep.mubr.msk.bf16.mxu0 %vm132_vm1, %v131_v0  ;;  %20 = vst.msk [vmem:[#allocation2] sm:$0xff] %vm19_vm0, %v131_v0  ;;  %21 = vst.msk [vmem:[#allocation2 + $0x8] sm:$0xff] %vm19_vm0, %v131_v0  ;;  %v130_v2 = vld [vmem:[%s181_s1] sm:$0xff]  }
   0x2   :  { %120 = vmatpush3.bf16.msra.mxu0 %v129_v1  ;;  %v24_v3 = vld [vmem:[%s182_s0] sm:$0xff]  ;;  %v25_v4 = vld [vmem:[%s182_s0 + $0x8] sm:$0xff] }
   0x3   :  { %121 = vmatprep.subr.bf16.mxu0 %v131_v0  ;;  %v26_v5 = vpack.c.bf16 %v25_v4, %v24_v3  ;;  %v115_v14 = vld [vmem:[%s183_s2] ss:$0 sm:$0xff] }
   0x6   :  { %122 = vmatpush3.bf16.msra.mxu0 %v130_v2 }
   0x8   :  { %v22_v6 = vld [vmem:[#allocation2] sm:$0xff]  ;;  %v23_v10 = vld [vmem:[#allocation2 + $0x8] sm:$0xff] }
   0x9   :  { %124 = vmatmul.mubr.msk.bf16.vlgmr.msra.gmra.mxu0 %vm19_vm0, %v26_v5 }
  0xc9   :  { %v81_v7 = vpop.f32.mrf.mxu0 }
  0xca   :  { %v88_v8 = vadd.f32 %v81_v7, %v22_v6 }
  0xcb   :  { %v125_v9 = vpop.f32.mrf.mxu0 }
  0xcc   :  { %90 = vst.msk [vmem:[#allocation2] sm:$0xff] %vm19_vm0, %v88_v8 }
  0xcd   :  { %v84_v11 = vpop.f32.mrf.mxu0 }
  0xce   :  { %v89_v12 = vadd.f32 %v84_v11, %v23_v10 }
  0xcf   :  { %v126_v13 = vpop.f32.mrf.mxu0 }
  0xd0   :  { %91 = vst.msk [vmem:[#allocation2 + $0x8] sm:$0xff] %vm19_vm0, %v89_v12 }
  0xd3   :  { %v95_v15 = vld [vmem:[#allocation2] sm:$0xff] }
  0xd4   :  { %v104_v16 = vadd.f32 %v115_v14, %v95_v15 }
  0xd6   :  { %106 = vst.msk [vmem:[%s184_s3] sm:$0xff] %vm19_vm0, %v104_v16 }
  0xd7   :  { %v96_v17 = vld [vmem:[#allocation2 + $0x8] sm:$0xff] }
  0xd8   :  { %v105_v18 = vadd.f32 %v115_v14, %v96_v17 }
  0xda   :  { %107 = vst.msk [vmem:[%s184_s3 + $0x8] sm:$0xff] %vm19_vm0, %v105_v18 }

// kernel: _decoder_forward.9
= control target key start
LH: loop header
LB: loop body
LE: loop exit
PB: predicated region body
PF: predicated region fallthrough
CT: control target
= control target key end

     0   :  { %vm19_vm0 = vcmask 523264   ;;  %v161_v1 = vmov 0.0   ;;  %vm50_vm1 = vcmask 261120   ;;  %s227_s1 = inlined_call_operand.vmem [shape: bf16[32,64], index: 1, kind: input, shape index: {}]   ;;  %s228_s0 = inlined_call_operand.vmem [shape: f32[32,32], index: 0, kind: input, shape index: {}]   ;;  %s229_s2 = inlined_call_operand.vmem [shape: f32[1,64], index: 2, kind: input, shape index: {}]   ;;  %s230_s3 = inlined_call_operand.vmem [shape: f32[32,64], index: 3, kind: output, shape index: {}]  }
   0x1   :  { %v159_v0 = vld [vmem:[%s227_s1 + $0x8] sm:$0xff]   ;;  %22 = vst.msk [vmem:[#allocation2 + $0x10] sm:$0xff] %vm19_vm0, %v161_v1  ;;  %20 = vst.msk [vmem:[#allocation2] sm:$0xff] %vm19_vm0, %v161_v1  ;;  %v160_v2 = vld [vmem:[%s227_s1] sm:$0xff]  }
   0x2   :  { %21 = vst.msk [vmem:[#allocation2 + $0x8] sm:$0xff] %vm19_vm0, %v161_v1  ;;  %23 = vst.msk [vmem:[#allocation2 + $0x18] sm:$0xff] %vm19_vm0, %v161_v1  ;;  %150 = vmatprep.subr.bf16.mxu0 %v159_v0  ;;  %v28_v3 = vld [vmem:[%s228_s0] sm:$0xff]  ;;  %v29_v4 = vld [vmem:[%s228_s0 + $0x8] sm:$0xff] }
   0x3   :  { %151 = vmatpush3.bf16.msra.mxu0 %v159_v0  ;;  %v32_v5 = vpack.c.bf16 %v29_v4, %v28_v3  ;;  %v30_v6 = vld [vmem:[%s228_s0 + $0x10] sm:$0xff]  ;;  %v31_v7 = vld [vmem:[%s228_s0 + $0x18] sm:$0xff]  ;;  %v145_v21 = vld [vmem:[%s229_s2] ss:$0 sm:$0xff] }
   0x4   :  { %152 = vmatprep.subr.bf16.mxu0 %v160_v2  ;;  %v33_v8 = vpack.c.bf16 %v31_v7, %v30_v6 }
   0x5   :  { %154 = vmatprep.mubr.msk.bf16.mxu0 %vm50_vm1, %v32_v5 }
   0x7   :  { %153 = vmatpush3.bf16.msra.mxu0 %v160_v2 }
   0x8   :  { %v26_v9 = vld [vmem:[#allocation2 + $0x10] sm:$0xff]  ;;  %v24_v11 = vld [vmem:[#allocation2] sm:$0xff] }
   0x9   :  { %v27_v14 = vld [vmem:[#allocation2 + $0x18] sm:$0xff]  ;;  %v25_v17 = vld [vmem:[#allocation2 + $0x8] sm:$0xff] }
   0xa   :  { %155 = vmatmul.mubr.msk.bf16.vlgmr.msra.gmra.mxu0 %vm50_vm1, %v33_v8 }
  0xca   :  { %v156_v10 = vpop.f32.mrf.mxu0 }
  0xcb   :  { %v108_v12 = vadd.f32 %v156_v10, %v26_v9 }
  0xcc   :  { %v91_v13 = vpop.f32.mrf.mxu0 }
  0xcd   :  { %113 = vst.msk [vmem:[#allocation2 + $0x10] sm:$0xff] %vm19_vm0, %v108_v12  ;;  %v106_v15 = vadd.f32 %v91_v13, %v24_v11 }
  0xce   :  { %v157_v16 = vpop.f32.mrf.mxu0 }
  0xcf   :  { %111 = vst.msk [vmem:[#allocation2] sm:$0xff] %vm19_vm0, %v106_v15  ;;  %v109_v18 = vadd.f32 %v157_v16, %v27_v14 }
  0xd0   :  { %v94_v19 = vpop.f32.mrf.mxu0 }
  0xd1   :  { %114 = vst.msk [vmem:[#allocation2 + $0x18] sm:$0xff] %vm19_vm0, %v109_v18  ;;  %v107_v20 = vadd.f32 %v94_v19, %v25_v17 }
  0xd3   :  { %112 = vst.msk [vmem:[#allocation2 + $0x8] sm:$0xff] %vm19_vm0, %v107_v20 }
  0xd4   :  { %v120_v22 = vld [vmem:[#allocation2 + $0x10] sm:$0xff] }
  0xd5   :  { %v131_v23 = vadd.f32 %v145_v21, %v120_v22 }
  0xd6   :  { %v118_v24 = vld [vmem:[#allocation2] sm:$0xff] }
  0xd7   :  { %135 = vst.msk [vmem:[%s230_s3 + $0x10] sm:$0xff] %vm19_vm0, %v131_v23  ;;  %v129_v25 = vadd.f32 %v145_v21, %v118_v24 }
  0xd8   :  { %v121_v26 = vld [vmem:[#allocation2 + $0x18] sm:$0xff] }
  0xd9   :  { %133 = vst.msk [vmem:[%s230_s3] sm:$0xff] %vm19_vm0, %v129_v25  ;;  %v132_v27 = vadd.f32 %v145_v21, %v121_v26 }
  0xda   :  { %v119_v28 = vld [vmem:[#allocation2 + $0x8] sm:$0xff] }
  0xdb   :  { %136 = vst.msk [vmem:[%s230_s3 + $0x18] sm:$0xff] %vm19_vm0, %v132_v27  ;;  %v130_v29 = vadd.f32 %v145_v21, %v119_v28 }
  0xdd   :  { %134 = vst.msk [vmem:[%s230_s3 + $0x8] sm:$0xff] %vm19_vm0, %v130_v29 }

// kernel: _decoder_forward.12
= control target key start
LH: loop header
LB: loop body
LE: loop exit
PB: predicated region body
PF: predicated region fallthrough
CT: control target
= control target key end

     0   :  { %s1527_s27 = smov 0   ;;  %s1529_s28 = smov 0   ;;  %s1748_s0 = inlined_call_operand.vmem [shape: f32[2,4,8,8], index: 0, kind: input, shape index: {}]   ;;  %s1749_s1 = inlined_call_operand.vmem [shape: f32[2,4,16,8], index: 1, kind: input, shape index: {}]   ;;  %s1750_s2 = inlined_call_operand.vmem [shape: f32[2,4,16,8], index: 2, kind: input, shape index: {}]   ;;  %s1751_s3 = inlined_call_operand.vmem [shape: bf16[32,32], index: 3, kind: input, shape index: {}]   ;;  %s1752_s4 = inlined_call_operand.vmem [shape: f32[1,32], index: 4, kind: input, shape index: {}]   ;;  %s1753_s5 = inlined_call_operand.vmem [shape: f32[2,8,32], index: 5, kind: input, shape index: {}]   ;;  %s1754_s6 = inlined_call_operand.vmem [shape: f32[1,32], index: 6, kind: input, shape index: {}]   ;;  %s1755_s7 = inlined_call_operand.vmem [shape: f32[1,32], index: 7, kind: input, shape index: {}]   ;;  %s1756_s8 = inlined_call_operand.vmem [shape: f32[2,8,32], index: 8, kind: output, shape index: {}]  }
   0x1   :  { %s1531_s29 = smov 0  }
   0x2 LB: > { %s37_s30 = sadd.s32 1, %s1469_s28  ;;  %p1287_p0 = scmp.ge.s32.totalorder %s1473_s29, 1  ;;  %s1473_s29 = sphi %s1531_s29, %s18_s29   ;;  %s1469_s28 = sphi %s1529_s28, %s1758_s28   ;;  %s1465_s27 = sphi %s1527_s27, %s1757_s27  }
   0x3   : > { %p39_p1 = scmp.ge.s32.totalorder %s37_s30, 2  ;;  %p336_p2 = scmp.lt.s32.totalorder %s1473_s29, 3 }
   0x5   : > { %s1760_s30 = smov (%p39_p1, %s37_s30), 0  ;;  %p337_p3 = pnand %p1287_p0, %p336_p2 }
   0x6   : > { %p400_p4 = scmp.lt.s32.totalorder (!%p337_p3), %s1465_s27, 1  ;;  %s1479_s22 = smov (!%p337_p3), 8  }
   0x7   : > { %340 = sbr.rel (%p337_p3) target bundleno = 1437 (0x59d), region = 52  ;;  %s1480_s25 = smov (!%p337_p3), 24  }
   0x8   : > { %s1481_s26 = smov (!%p337_p3), 16  }
   0xc   : > { %vm456_vm0 = vcmask 64512   ;;  %v1475_v0 = vmov 0.0   ;;  %s1762_s27 = smov (!%p400_p4, %s1465_s27), 1  ;;  %vm1476_vm1 = vmmov 0   ;;  %vm447_vm2 = vcmask 7168  }
   0xd   : > { %1334 = vmatprep.subr.bf16.mxu0 %v1475_v0  ;;  %1340 = vmatprep.subr.bf16.mxu1 %v1475_v0  ;;  %457 = vst.msk [vmem:[#allocation4] sm:$0xff] %vm456_vm0, %v1475_v0  ;;  %458 = vst.msk [vmem:[#allocation4 + $0x8] sm:$0xff] %vm456_vm0, %v1475_v0  ;;  %s1313_s9 = sshll.u32 %s1762_s27, 6  ;;  %s1312_s10 = sshll.u32 %s1762_s27, 5  ;;  %v1477_v29 = vmov -inf   ;;  %vm686_vm3 = vcmask 130048  }
   0xe   : > { %459 = vst.msk [vmem:[#allocation4 + $0x10] sm:$0xff] %vm456_vm0, %v1475_v0  ;;  %460 = vst.msk [vmem:[#allocation4 + $0x18] sm:$0xff] %vm456_vm0, %v1475_v0  ;;  %1336 = vmatprep.mubr.msk.bf16.mxu0 %vm1476_vm1, %v1475_v0  ;;  %1342 = vmatprep.mubr.msk.bf16.mxu1 %vm1476_vm1, %v1475_v0  ;;  %s416_s13 = scalar_lea.vmem %s1749_s1, %s1313_s9  ;;  %s407_s16 = scalar_lea.vmem %s1748_s0, %s1312_s10  ;;  %v1478_v49 = vmov 0   ;;  %vm1036_vm4 = vcmask 130112   ;;  %vm1042_vm5 = vcmask 195712   ;;  %vm1048_vm6 = vcmask 261312  }
   0xf   : > { %v473_v1 = vld [vmem:[%s416_s13] sm:$0xff]  ;;  %v474_v2 = vld [vmem:[%s416_s13 + $0x8] sm:$0xff]  ;;  %v475_v3 = vld [vmem:[%s416_s13 + $0x10] sm:$0xff]  ;;  %448 = vst.msk [vmem:[#allocation2] sm:$0xff] %vm447_vm2, %v1477_v29  ;;  %1421 = vset.pattern.permute.xlu0 %v1478_v49  ;;  %1422 = vset.pattern.permute.xlu1 %v1478_v49  ;;  %s1648_s19 = scalar_lea.vmem %s1750_s2, %s1313_s9  ;;  %vm1075_vm7 = vcmask 261120   ;;  %s1294_s9 = sshll.u32 %s1762_s27, 3 }
  0x10   : > { %v481_v4 = vpack.c.bf16 %v474_v2, %v473_v1  ;;  %v476_v5 = vld [vmem:[%s416_s13 + $0x18] sm:$0xff]  ;;  %v461_v6 = vld [vmem:[%s407_s16] sm:$0xff]  ;;  %v462_v7 = vld [vmem:[%s407_s16 + $0x8] sm:$0xff]  ;;  %449 = vst.msk [vmem:[#allocation2 + $0x8] sm:$0xff] %vm447_vm2, %v1477_v29  ;;  %s434_s12 = scalar_lea.vmem %s1753_s5, %s1294_s9  ;;  %s441_s20 = scalar_lea.vmem %s1756_s8, %s1294_s9 }
  0x11   : > { %v482_v8 = vpack.c.bf16 %v476_v5, %v475_v3  ;;  %v477_v9 = vld [vmem:[%s416_s13 + $0x20] sm:$0xff]  ;;  %v478_v10 = vld [vmem:[%s416_s13 + $0x28] sm:$0xff]  ;;  %v465_v12 = vmul.f32 0.35355338, %v461_v6  ;;  %v479_v13 = vld [vmem:[%s416_s13 + $0x30] sm:$0xff]  ;;  %450 = vst.msk [vmem:[#allocation2 + $0x10] sm:$0xff] %vm447_vm2, %v1477_v29 }
  0x12   : > { %v502_v11 = vsel %vm456_vm0, %v481_v4, 0  ;;  %v480_v14 = vld [vmem:[%s416_s13 + $0x38] sm:$0xff]  ;;  %v466_v16 = vmul.f32 0.35355338, %v462_v7  ;;  %v483_v17 = vpack.c.bf16 %v478_v10, %v477_v9  ;;  %v463_v21 = vld [vmem:[%s407_s16 + $0x10] sm:$0xff]  ;;  %451 = vst.msk [vmem:[#allocation2 + $0x18] sm:$0xff] %vm447_vm2, %v1477_v29 }
  0x13   : > { %1335 = vmatpush3.bf16.xpose.msra.mxu0 %v502_v11  ;;  %v548_v15 = vsel %vm456_vm0, %v482_v8, 0  ;;  %v484_v18 = vpack.c.bf16 %v480_v14, %v479_v13  ;;  %v469_v19 = vpack.c.bf16 %v465_v12, %v465_v12  ;;  %v464_v23 = vld [vmem:[%s407_s16 + $0x18] sm:$0xff]  ;;  %v467_v25 = vmul.f32 0.35355338, %v463_v21  ;;  %452 = vst.msk [vmem:[#allocation3] sm:$0xff] %vm447_vm2, %v1475_v0  ;;  %453 = vst.msk [vmem:[#allocation3 + $0x8] sm:$0xff] %vm447_vm2, %v1475_v0 }
  0x14   : > { %1341 = vmatpush3.bf16.xpose.msra.mxu1 %v548_v15  ;;  %1346 = vmatprep.subr.bf16.mxu0 %v1475_v0  ;;  %v470_v20 = vpack.c.bf16 %v466_v16, %v466_v16  ;;  %v594_v22 = vsel %vm456_vm0, %v483_v17, 0  ;;  %v468_v26 = vmul.f32 0.35355338, %v464_v23  ;;  %454 = vst.msk [vmem:[#allocation3 + $0x10] sm:$0xff] %vm447_vm2, %v1475_v0  ;;  %455 = vst.msk [vmem:[#allocation3 + $0x18] sm:$0xff] %vm447_vm2, %v1475_v0  ;;  %v485_v3 = vld [vmem:[%s1648_s19] sm:$0xff] }
  0x15   : > { %1352 = vmatprep.subr.bf16.mxu1 %v1475_v0  ;;  %v640_v24 = vsel %vm456_vm0, %v484_v18, 0  ;;  %v471_v27 = vpack.c.bf16 %v467_v25, %v467_v25  ;;  %v486_v4 = vld [vmem:[%s1648_s19 + $0x8] sm:$0xff]  ;;  %v487_v7 = vld [vmem:[%s1648_s19 + $0x10] sm:$0xff]  ;;  %v488_v8 = vld [vmem:[%s1648_s19 + $0x18] sm:$0xff] }
  0x16   : > { %v472_v28 = vpack.c.bf16 %v468_v26, %v468_v26  ;;  %v1616_v51 = vld [vmem:[#allocation2] sm:$0xff]  ;;  %v493_v6 = vpack.c.bf16 %v486_v4, %v485_v3  ;;  %v494_v9 = vpack.c.bf16 %v488_v8, %v487_v7  ;;  %v490_v23 = vld [vmem:[%s1648_s19 + $0x28] sm:$0xff] }
  0x17   : > { %v1621_v54 = vld [vmem:[#allocation2 + $0x8] sm:$0xff] }
  0x18   : > { %v1631_v58 = vld [vmem:[#allocation2 + $0x10] sm:$0xff] }
  0x19   : > { %v1641_v62 = vld [vmem:[#allocation2 + $0x18] sm:$0xff] }
  0x1a   : > { %1337 = vmatmul.mubr.msk.bf16.vlgmr.msra.gmra.mxu0 %vm456_vm0, %v469_v19 }
  0x1b   : > { %1343 = vmatmul.mubr.msk.bf16.vlgmr.msra.gmra.mxu1 %vm456_vm0, %v470_v20  ;;  %1347 = vmatpush3.bf16.xpose.msra.mxu0 %v594_v22  ;;  %v489_v22 = vld [vmem:[%s1648_s19 + $0x20] sm:$0xff]  ;;  %v749_v49 = vld [vmem:[#allocation3 + $0x10] sm:$0xff] }
  0x1c   : > { %1353 = vmatpush3.bf16.xpose.msra.mxu1 %v640_v24  ;;  %1348 = vmatprep.mubr.msk.bf16.mxu0 %vm1476_vm1, %v1475_v0  ;;  %v495_v25 = vpack.c.bf16 %v490_v23, %v489_v22 }
  0x1d   : > { %1354 = vmatprep.mubr.msk.bf16.mxu1 %vm1476_vm1, %v1475_v0  ;;  %1358 = vmatprep.subr.bf16.mxu0 %v1475_v0 }
  0x1e   : > { %1364 = vmatprep.subr.bf16.mxu1 %v1475_v0 }
  0x22   : > { %1349 = vmatmul.mubr.msk.bf16.vlgmr.msra.gmra.mxu0 %vm456_vm0, %v471_v27  ;;  %v491_v27 = vld [vmem:[%s1648_s19 + $0x30] sm:$0xff] }
  0x23   : > { %1355 = vmatmul.mubr.msk.bf16.vlgmr.msra.gmra.mxu1 %vm456_vm0, %v472_v28  ;;  %1360 = vmatprep.mubr.msk.bf16.mxu0 %vm1476_vm1, %v1475_v0  ;;  %v492_v28 = vld [vmem:[%s1648_s19 + $0x38] sm:$0xff] }
  0x24   : > { %1366 = vmatprep.mubr.msk.bf16.mxu1 %vm1476_vm1, %v1475_v0  ;;  %1359 = vmatpush3.bf16.msra.mxu0 %v493_v6 }
  0x25   : > { %1370 = vmatprep.subr.bf16.mxu0 %v1475_v0  ;;  %1365 = vmatpush3.bf16.msra.mxu1 %v494_v9 }
  0x26   : > { %1376 = vmatprep.subr.bf16.mxu1 %v1475_v0 }
  0xda   : > { %v1603_v30 = vpop.f32.mrf.mxu0 }
  0xdb   : > { %v1605_v31 = vpop.f32.mrf.mxu1  ;;  %v687_v32 = vsel %vm686_vm3, %v1603_v30, -inf }
  0xdc   : > { %688 = vmax.xlane.f32.xlu0 %v687_v32  ;;  %v1338_v33 = vpop.f32.mrf.mxu0  ;;  %v690_v35 = vsel %vm686_vm3, %v1605_v31, -inf }
  0xdd   : > { %v1344_v34 = vpop.f32.mrf.mxu1 }
  0xde   : > { %v541_v36 = vpop.f32.mrf.mxu0 }
  0xdf   : > { %v587_v37 = vpop.f32.mrf.mxu1 }
  0xe0   : > { %691 = vmax.xlane.f32.xlu0 %v690_v35  ;;  %v1339_v38 = vpop.f32.mrf.mxu0 }
  0xe1   : > { %v1345_v39 = vpop.f32.mrf.mxu1 }
  0xe2   : > { %v630_v40 = vpop.f32.mrf.mxu0 }
  0xe3   : > { %v1611_v41 = vpop.f32.mrf.mxu1  ;;  %v693_v42 = vsel %vm686_vm3, %v630_v40, -inf }
  0xe4   : > { %694 = vmax.xlane.f32.xlu1 %v693_v42  ;;  %v1350_v43 = vpop.f32.mrf.mxu0  ;;  %v696_v45 = vsel %vm686_vm3, %v1611_v41, -inf }
  0xe5   : > { %v1356_v44 = vpop.f32.mrf.mxu1 }
  0xe6   : > { %v633_v46 = vpop.f32.mrf.mxu0 }
  0xe7   : > { %v679_v47 = vpop.f32.mrf.mxu1 }
  0xe8   : > { %697 = vmax.xlane.f32.xlu1 %v696_v45  ;;  %v1351_v48 = vpop.f32.mrf.mxu0  ;;  %v748_v45 = vld [vmem:[#allocation3 + $0x8] sm:$0xff] }
  0xe9   : > { %v1357_v50 = vpop.f32.mrf.mxu1 }
 0x165   : > { %v689_v52 = vpop.xlane.xlu0 %688 }
 0x166   : > { %v1619_v53 = vmax.f32 %v1616_v51, %v689_v52 }
 0x168   : > { %v703_v55 = vsub.f32 %v1616_v51, %v1619_v53  ;;  %988 = vst.msk [vmem:[#allocation2] sm:$0xff] %vm447_vm2, %v1619_v53  ;;  %717 = vperm.xlu0 %1421, %v1619_v53  }
 0x169   : > { %v692_v56 = vpop.xlane.xlu0 %691 }
 0x16a   : > { %v1629_v57 = vmax.f32 %v1621_v54, %v692_v56  ;;  %v707_v44 = vmul.f32 1.442695, %v703_v55  ;;  %v747_v55 = vld [vmem:[#allocation3] sm:$0xff] }
 0x16c   : > { %v704_v59 = vsub.f32 %v1621_v54, %v1629_v57  ;;  %989 = vst.msk [vmem:[#allocation2 + $0x8] sm:$0xff] %vm447_vm2, %v1629_v57  ;;  %722 = vperm.xlu1 %1422, %v1629_v57   ;;  %v750_v57 = vld [vmem:[#allocation3 + $0x18] sm:$0xff] }
 0x16d   : > { %v695_v60 = vpop.xlane.xlu1 %694 }
 0x16e   : > { %v1639_v61 = vmax.f32 %v1631_v58, %v695_v60  ;;  %v709_v39 = vmul.f32 1.442695, %v704_v59 }
 0x170   : > { %v705_v63 = vsub.f32 %v1631_v58, %v1639_v61  ;;  %990 = vst.msk [vmem:[#allocation2 + $0x10] sm:$0xff] %vm447_vm2, %v1639_v61  ;;  %727 = vperm.xlu1 %1422, %v1639_v61  }
 0x171   : > { %v698_v1 = vpop.xlane.xlu1 %697 }
 0x172   : > { %v1656_v2 = vmax.f32 %v1641_v62, %v698_v1  ;;  %v711_v42 = vmul.f32 1.442695, %v705_v63 }
 0x174   : > { %v706_v5 = vsub.f32 %v1641_v62, %v1656_v2  ;;  %991 = vst.msk [vmem:[#allocation2 + $0x18] sm:$0xff] %vm447_vm2, %v1656_v2  ;;  %732 = vperm.xlu1 %1422, %v1656_v2  }
 0x176   : > { %v713_v43 = vmul.f32 1.442695, %v706_v5  ;;  %v777_v5 = vld [vmem:[#allocation4 + $0x8] sm:$0xff] }
 0x1e3   : > { %v718_v10 = vpop.permute.xlu0 %717 }
 0x1e4   : > { %v735_v11 = vsub.f32 %v1603_v30, %v718_v10  ;;  %v496_v30 = vpack.c.bf16 %v492_v28, %v491_v27  ;;  %v779_v27 = vld [vmem:[#allocation4 + $0x18] sm:$0xff] }
 0x1e6   : > { %v739_v12 = vmul.f32 1.442695, %v735_v11 }
 0x1e7   : > { %v723_v13 = vpop.permute.xlu1 %722 }
 0x1e8   : > { %1425 = vpow2.f32 %v739_v12  ;;  %v736_v14 = vsub.f32 %v1605_v31, %v723_v13 }
 0x1ea   : > { %v741_v15 = vmul.f32 1.442695, %v736_v14 }
 0x1eb   : > { %v728_v16 = vpop.permute.xlu1 %727 }
 0x1ec   : > { %1427 = vpow2.f32 %v741_v15  ;;  %v737_v17 = vsub.f32 %v630_v40, %v728_v16 }
 0x1ee   : > { %v743_v18 = vmul.f32 1.442695, %v737_v17 }
 0x1ef   : > { %v733_v19 = vpop.permute.xlu1 %732 }
 0x1f0   : > { %1429 = vpow2.f32 %v743_v18  ;;  %v738_v20 = vsub.f32 %v1611_v41, %v733_v19 }
 0x1f2   : > { %v745_v21 = vmul.f32 1.442695, %v738_v20 }
 0x1f4   : > { %1431 = vpow2.f32 %v745_v21 }
 0x1f5   : > { %v1426_v24 = vpop.eup %1425  ;;  %1433 = vpow2.f32 %v709_v39 }
 0x1f6   : > { %v804_v26 = vpack.c.bf16 %v1426_v24, %v1426_v24  ;;  %v755_v40 = vsel %vm686_vm3, %v1426_v24, 0.0  ;;  %1435 = vpow2.f32 %v711_v42 }
 0x1f7   : > { %1437 = vpow2.f32 %v713_v43  ;;  %v1423_v43 = vld [vmem:[%s1751_s3 + $0x8] sm:$0xff]  }
 0x1f8   : > { %1361 = vmatmul.mubr.msk.bf16.vlgmr.msra.gmra.mxu0 %vm686_vm3, %v804_v26  ;;  %1439 = vpow2.f32 %v707_v44 }
 0x1f9   : > { %v1428_v29 = vpop.eup %1427  ;;  %1371 = vmatpush3.bf16.msra.mxu0 %v495_v25  ;;  %1372 = vmatprep.mubr.msk.bf16.mxu0 %vm1476_vm1, %v1475_v0 }
 0x1fa   : > { %v758_v31 = vsel %vm686_vm3, %v1428_v29, 0.0  ;;  %v805_v32 = vpack.c.bf16 %v1428_v29, %v1428_v29  ;;  %1382 = vmatprep.subr.bf16.mxu0 %v1475_v0 }
 0x1fb   : > { %759 = vadd.xlane.f32.xlu1 %v758_v31  ;;  %v776_v31 = vld [vmem:[#allocation4] sm:$0xff] }
 0x1fc   : > { %1367 = vmatmul.mubr.msk.bf16.vlgmr.msra.gmra.mxu1 %vm686_vm3, %v805_v32  ;;  %v778_v32 = vld [vmem:[#allocation4 + $0x10] sm:$0xff] }
 0x1fd   : > { %v1430_v33 = vpop.eup %1429  ;;  %1377 = vmatpush3.bf16.msra.mxu1 %v496_v30  ;;  %1378 = vmatprep.mubr.msk.bf16.mxu1 %vm1476_vm1, %v1475_v0 }
 0x1fe   : > { %v761_v34 = vsel %vm686_vm3, %v1430_v33, 0.0  ;;  %v806_v35 = vpack.c.bf16 %v1430_v33, %v1430_v33 }
 0x1ff   : > { %762 = vadd.xlane.f32.xlu0 %v761_v34 }
 0x200   : > { %1373 = vmatmul.mubr.msk.bf16.vlgmr.msra.gmra.mxu0 %vm686_vm3, %v806_v35 }
 0x201   : > { %v1432_v36 = vpop.eup %1431  ;;  %1386 = vmatprep.mubr.msk.bf16.mxu0 %vm1476_vm1, %v1475_v0  ;;  %1383 = vmatpush3.bf16.msra.mxu0 %v1423_v43 }
 0x202   : > { %v764_v37 = vsel %vm686_vm3, %v1432_v36, 0.0  ;;  %v807_v38 = vpack.c.bf16 %v1432_v36, %v1432_v36  ;;  %v1434_v41 = vpop.eup %1433  ;;  %1384 = vmatprep.subr.bf16.mxu0 %v1475_v0 }
 0x203   : > { %765 = vadd.xlane.f32.xlu1 %v764_v37  ;;  %v752_v46 = vmul.f32 %v1434_v41, %v748_v45  ;;  %v1436_v47 = vpop.eup %1435  ;;  %v1424_v45 = vld [vmem:[%s1751_s3] sm:$0xff]  }
 0x204   : > { %1379 = vmatmul.mubr.msk.bf16.vlgmr.msra.gmra.mxu1 %vm686_vm3, %v807_v38  ;;  %v753_v52 = vmul.f32 %v1436_v47, %v749_v49  ;;  %v1438_v54 = vpop.eup %1437 }
 0x205   : > { %v754_v59 = vmul.f32 %v1438_v54, %v750_v57  ;;  %v1440_v51 = vpop.eup %1439  ;;  %1385 = vmatpush3.bf16.msra.mxu0 %v1424_v45 }
 0x206   : > { %v751_v62 = vmul.f32 %v1440_v51, %v747_v55  ;;  %v1304_v55 = vld [vmem:[%s1752_s4] ss:$0 sm:$0xff] }
 0x207   : > { %756 = vadd.xlane.f32.xlu1 %v755_v40 }
 0x218   : > { %787 = vperm.xlu1 %1422, %v1434_v41  }
 0x284   : > { %v760_v48 = vpop.xlane.xlu1 %759 }
 0x285   : > { %v768_v50 = vadd.f32 %v760_v48, %v752_v46 }
 0x287   : > { %773 = vst.msk [vmem:[#allocation3 + $0x8] sm:$0xff] %vm447_vm2, %v768_v50 }
 0x288   : > { %v763_v56 = vpop.xlane.xlu0 %762 }
 0x289   : > { %v769_v58 = vadd.f32 %v763_v56, %v753_v52 }
 0x28b   : > { %774 = vst.msk [vmem:[#allocation3 + $0x10] sm:$0xff] %vm447_vm2, %v769_v58 }
 0x28c   : > { %v766_v53 = vpop.xlane.xlu1 %765 }
 0x28d   : > { %v770_v60 = vadd.f32 %v766_v53, %v754_v59 }
 0x28e   : > { %v1000_v61 = vld [vmem:[#allocation3 + $0x8] sm:$0xff] }
 0x28f   : > { %775 = vst.msk [vmem:[#allocation3 + $0x18] sm:$0xff] %vm447_vm2, %v770_v60  ;;  %1010 = vperm.xlu1 %1422, %v1000_v61   ;;  %v1119_v61 = vld [vmem:[%s434_s12] sm:$0xff] }
 0x290   : > { %v757_v63 = vpop.xlane.xlu1 %756 }
 0x291   : > { %v767_v1 = vadd.f32 %v757_v63, %v751_v62 }
 0x292   : > { %v1001_v2 = vld [vmem:[#allocation3 + $0x10] sm:$0xff] }
 0x293   : > { %772 = vst.msk [vmem:[#allocation3] sm:$0xff] %vm447_vm2, %v767_v1  ;;  %1015 = vperm.xlu0 %1421, %v1001_v2  }
 0x294   : > { %v788_v6 = vpop.permute.xlu1 %787 }
 0x295   : > { %v801_v9 = vmul.f32 %v788_v6, %v777_v5 }
 0x296   : > { %v1002_v3 = vld [vmem:[#allocation3 + $0x18] sm:$0xff] }
 0x297   : > { %797 = vperm.xlu0 %1421, %v1438_v54   ;;  %1020 = vperm.xlu1 %1422, %v1002_v3  }
 0x29a   : > { %v999_v4 = vld [vmem:[#allocation3] sm:$0xff] }
 0x29b   : > { %782 = vperm.xlu0 %1421, %v1440_v51   ;;  %792 = vperm.xlu1 %1422, %v1436_v47  }
 0x29f   : > { %1005 = vperm.xlu1 %1422, %v999_v4  }
 0x2b8   : > { %v845_v7 = vpop.f32.mrf.mxu0 }
 0x2ba   : > { %v1362_v8 = vpop.f32.mrf.mxu0 }
 0x2bc   : > { %v848_v10 = vpop.f32.mrf.mxu0  ;;  %v888_v11 = vpop.f32.mrf.mxu1 }
 0x2bd   : > { %v981_v12 = vadd.f32 %v888_v11, %v801_v9 }
 0x2be   : > { %v1363_v13 = vpop.f32.mrf.mxu0  ;;  %v1368_v14 = vpop.f32.mrf.mxu1 }
 0x2bf   : > { %985 = vst.msk [vmem:[#allocation4 + $0x8] sm:$0xff] %vm456_vm0, %v981_v12  ;;  %v1308_v14 = vld [vmem:[%s1754_s6] ss:$0 sm:$0xff] }
 0x2c0   : > { %v891_v15 = vpop.f32.mrf.mxu1  ;;  %v931_v16 = vpop.f32.mrf.mxu0 }
 0x2c2   : > { %v1369_v17 = vpop.f32.mrf.mxu1  ;;  %v1374_v18 = vpop.f32.mrf.mxu0 }
 0x2c4   : > { %v934_v19 = vpop.f32.mrf.mxu0  ;;  %v974_v20 = vpop.f32.mrf.mxu1 }
 0x2c6   : > { %v1375_v21 = vpop.f32.mrf.mxu0  ;;  %v1380_v22 = vpop.f32.mrf.mxu1  ;;  %v996_v39 = vld [vmem:[#allocation4 + $0x8] sm:$0xff] }
 0x2c8   : > { %v977_v23 = vpop.f32.mrf.mxu1 }
 0x2ca   : > { %v1381_v24 = vpop.f32.mrf.mxu1 }
 0x30a   : > { %v1011_v25 = vpop.permute.xlu1 %1010 }
 0x30b   : > { %1441 = vrcp.f32 %v1011_v25 }
 0x30e   : > { %v1016_v26 = vpop.permute.xlu0 %1015 }
 0x312   : > { %v798_v28 = vpop.permute.xlu0 %797  ;;  %v1021_v29 = vpop.permute.xlu1 %1020 }
 0x313   : > { %v803_v30 = vmul.f32 %v798_v28, %v779_v27  ;;  %1443 = vrcp.f32 %v1021_v29 }
 0x314   : > { %1445 = vrcp.f32 %v1016_v26 }
 0x315   : > { %v983_v33 = vadd.f32 %v974_v20, %v803_v30 }
 0x316   : > { %v783_v34 = vpop.permute.xlu0 %782  ;;  %v793_v35 = vpop.permute.xlu1 %792 }
 0x317   : > { %987 = vst.msk [vmem:[#allocation4 + $0x18] sm:$0xff] %vm456_vm0, %v983_v33  ;;  %v800_v36 = vmul.f32 %v783_v34, %v776_v31  ;;  %v802_v37 = vmul.f32 %v793_v35, %v778_v32 }
 0x318   : > { %v1442_v38 = vpop.eup %1441 }
 0x319   : > { %v980_v40 = vadd.f32 %v845_v7, %v800_v36  ;;  %v982_v41 = vadd.f32 %v931_v16, %v802_v37  ;;  %v1026_v42 = vmul.f32 %v1442_v38, %v996_v39  ;;  %v1309_v16 = vld [vmem:[%s1755_s7] ss:$0 sm:$0xff] }
 0x31a   : > { %v1006_v44 = vpop.permute.xlu1 %1005 }
 0x31b   : > { %984 = vst.msk [vmem:[#allocation4] sm:$0xff] %vm456_vm0, %v980_v40  ;;  %986 = vst.msk [vmem:[#allocation4 + $0x10] sm:$0xff] %vm456_vm0, %v982_v41  ;;  %1447 = vrcp.f32 %v1006_v44  ;;  %1033 = vrot.lane.b32.xlu1 %v1026_v42, %s1479_s22 }
 0x31e   : > { %v998_v47 = vld [vmem:[#allocation4 + $0x18] sm:$0xff] }
 0x320   : > { %v1444_v46 = vpop.eup %1443 }
 0x321   : > { %v1030_v48 = vmul.f32 %v1444_v46, %v998_v47  ;;  %v1446_v49 = vpop.eup %1445 }
 0x322   : > { %v997_v50 = vld [vmem:[#allocation4 + $0x10] sm:$0xff]  ;;  %v995_v56 = vld [vmem:[#allocation4] sm:$0xff] }
 0x323   : > { %1045 = vrot.lane.b32.xlu1 %v1030_v48, %s1480_s25  ;;  %v1028_v52 = vmul.f32 %v1446_v49, %v997_v50 }
 0x325   : > { %1039 = vrot.lane.b32.xlu0 %v1028_v52, %s1481_s26 }
 0x328   : > { %v1448_v54 = vpop.eup %1447 }
 0x329   : > { %v1024_v57 = vmul.f32 %v1448_v54, %v995_v56 }
 0x32b   : > { %1031 = vst.msk [vmem:[#allocation5] sm:$0xff] %vm456_vm0, %v1024_v57 }
 0x38d   : > { %v1034_v58 = vpop.permute.xlu1 %1033 }
 0x38e   : > { %1037 = vst.msk [vmem:[#allocation5] sm:$0xff] %vm1036_vm4, %v1034_v58 }
 0x395   : > { %v1046_v59 = vpop.permute.xlu1 %1045 }
 0x397   : > { %v1040_v0 = vpop.permute.xlu0 %1039 }
 0x398   : > { %1043 = vst.msk [vmem:[#allocation5] sm:$0xff] %vm1042_vm5, %v1040_v0 }
 0x399   : > { %1049 = vst.msk [vmem:[#allocation5] sm:$0xff] %vm1048_vm6, %v1046_v59 }
 0x3a0   : > { %v1050_v51 = vld [vmem:[#allocation5] sm:$0xff] }
 0x3a1   : > { %v1051_v53 = vpack.c.bf16 %v1050_v51, %v1050_v51 }
 0x3a3   : > { %1387 = vmatmul.mubr.msk.bf16.vlgmr.msra.gmra.mxu0 %vm1075_vm7, %v1051_v53 }
 0x463   : > { %v1113_v60 = vpop.f32.mrf.mxu0 }
 0x464   : > { %v1114_v62 = vadd.f32 %v1304_v55, %v1113_v60 }
 0x465   : > { %v1388_v63 = vpop.f32.mrf.mxu0 }
 0x466   : > { %v1120_v1 = vadd.f32 %v1119_v61, %v1114_v62 }
 0x467   : > { %v1116_v2 = vpop.f32.mrf.mxu0 }
 0x468   : > { %v1121_v3 = vsel %vm1075_vm7, %v1120_v1, 0.0 }
 0x469   : > { %1122 = vadd.xlane.f32.xlu0 %v1121_v3  ;;  %v1389_v4 = vpop.f32.mrf.mxu0 }
 0x4f2   : > { %v1123_v5 = vpop.xlane.xlu0 %1122 }
 0x4f3   : > { %v1125_v6 = vmul.f32 0.03125, %v1123_v5 }
 0x4f5   : > { %v1126_v7 = vsub.f32 %v1120_v1, %v1125_v6 }
 0x4f7   : > { %v1127_v8 = vmul.f32 %v1126_v7, %v1126_v7 }
 0x4f9   : > { %v1128_v9 = vsel %vm1075_vm7, %v1127_v8, 0.0 }
 0x4fa   : > { %1129 = vadd.xlane.f32.xlu1 %v1128_v9 }
 0x583   : > { %v1130_v10 = vpop.xlane.xlu1 %1129 }
 0x584   : > { %v1131_v11 = vmul.f32 0.03125, %v1130_v10 }
 0x586   : > { %v1132_v12 = vadd.f32 1e-05, %v1131_v11 }
 0x588   : > { %1449 = vrsqrt.f32 %v1132_v12 }
 0x595   : > { %v1450_v13 = vpop.eup %1449 }
 0x596   : > { %v1134_v15 = vmul.f32 %v1450_v13, %v1126_v7 }
 0x598   : > { %v1142_v17 = vmul.f32 %v1308_v14, %v1134_v15 }
 0x59a   : > { %v1150_v18 = vadd.f32 %v1309_v16, %v1142_v17 }
 0x59c   : > { %1151 = vst.msk [vmem:[%s441_s20] sm:$0xff] %vm1075_vm7, %v1150_v18 }
 0x59d PF: > { %s18_s29 = sadd.s32 1, %s1473_s29   ;;  %s1757_s27 = smov %s1469_s28 }
 0x59e   : > { %p15_p5 = scmp.ge.s32.totalorder %s18_s29, 4   ;;  %s1758_s28 = smov %s1760_s30 }
 0x5a0   :  { %17 = sbr.rel (!%p15_p5) target bundleno = 2 (0x2), region = 99 }

// kernel: _decoder_forward.17
= control target key start
LH: loop header
LB: loop body
LE: loop exit
PB: predicated region body
PF: predicated region fallthrough
CT: control target
= control target key end

     0   :  { %vm16_vm0 = vcmask 261120   ;;  %s118_s0 = inlined_call_operand.vmem [shape: f32[16,32], index: 0, kind: input, shape index: {}]   ;;  %s119_s1 = inlined_call_operand.vmem [shape: f32[1,32], index: 1, kind: input, shape index: {}]   ;;  %s120_s2 = inlined_call_operand.vmem [shape: f32[1,32], index: 2, kind: input, shape index: {}]   ;;  %s121_s3 = inlined_call_operand.vmem [shape: f32[16,32], index: 3, kind: output, shape index: {}]  }
   0x1   :  { %v14_v0 = vld [vmem:[%s118_s0] sm:$0xff]  ;;  %v15_v1 = vld [vmem:[%s118_s0 + $0x8] sm:$0xff] }
   0x2   :  { %v17_v2 = vsel %vm16_vm0, %v14_v0, 0.0  ;;  %v20_v3 = vsel %vm16_vm0, %v15_v1, 0.0  ;;  %v68_v21 = vld [vmem:[%s119_s1] ss:$0 sm:$0xff] }
   0x3   :  { %18 = vadd.xlane.f32.xlu0 %v17_v2  ;;  %v69_v23 = vld [vmem:[%s120_s2] ss:$0 sm:$0xff] }
   0x7   :  { %21 = vadd.xlane.f32.xlu0 %v20_v3 }
  0x8c   :  { %v19_v4 = vpop.xlane.xlu0 %18 }
  0x8d   :  { %v24_v5 = vmul.f32 0.03125, %v19_v4 }
  0x8f   :  { %v26_v6 = vsub.f32 %v14_v0, %v24_v5 }
  0x90   :  { %v22_v7 = vpop.xlane.xlu0 %21 }
  0x91   :  { %v25_v8 = vmul.f32 0.03125, %v22_v7  ;;  %v28_v9 = vmul.f32 %v26_v6, %v26_v6 }
  0x93   :  { %v27_v10 = vsub.f32 %v15_v1, %v25_v8  ;;  %v30_v11 = vsel %vm16_vm0, %v28_v9, 0.0 }
  0x94   :  { %31 = vadd.xlane.f32.xlu1 %v30_v11 }
  0x95   :  { %v29_v12 = vmul.f32 %v27_v10, %v27_v10 }
  0x97   :  { %v33_v13 = vsel %vm16_vm0, %v29_v12, 0.0 }
  0x98   :  { %34 = vadd.xlane.f32.xlu1 %v33_v13 }
 0x11d   :  { %v32_v14 = vpop.xlane.xlu1 %31 }
 0x11e   :  { %v36_v15 = vmul.f32 0.03125, %v32_v14 }
 0x120   :  { %v38_v16 = vadd.f32 1e-05, %v36_v15 }
 0x121   :  { %v35_v17 = vpop.xlane.xlu1 %34 }
 0x122   :  { %70 = vrsqrt.f32 %v38_v16  ;;  %v37_v18 = vmul.f32 0.03125, %v35_v17 }
 0x124   :  { %v39_v19 = vadd.f32 1e-05, %v37_v18 }
 0x126   :  { %72 = vrsqrt.f32 %v39_v19 }
 0x12f   :  { %v71_v20 = vpop.eup %70 }
 0x130   :  { %v42_v22 = vmul.f32 %v71_v20, %v26_v6 }
 0x132   :  { %v51_v24 = vmul.f32 %v68_v21, %v42_v22 }
 0x133   :  { %v73_v25 = vpop.eup %72 }
 0x134   :  { %v60_v26 = vadd.f32 %v69_v23, %v51_v24  ;;  %v43_v27 = vmul.f32 %v73_v25, %v27_v10 }
 0x136   :  { %62 = vst.msk [vmem:[%s121_s3] sm:$0xff] %vm16_vm0, %v60_v26  ;;  %v52_v28 = vmul.f32 %v68_v21, %v43_v27 }
 0x138   :  { %v61_v29 = vadd.f32 %v69_v23, %v52_v28 }
 0x13a   :  { %63 = vst.msk [vmem:[%s121_s3 + $0x8] sm:$0xff] %vm16_vm0, %v61_v29 }

// kernel: _decoder_forward.13
= control target key start
LH: loop header
LB: loop body
LE: loop exit
PB: predicated region body
PF: predicated region fallthrough
CT: control target
= control target key end

     0   :  { %v2596_v3 = vmov 0   ;;  %vm306_vm0 = vcmask 261120   ;;  %s3280_s1 = inlined_call_operand.vmem [shape: bf16[32,2048], index: 1, kind: input, shape index: {}]   ;;  %s3281_s0 = inlined_call_operand.vmem [shape: f32[16,32], index: 0, kind: input, shape index: {}]   ;;  %s3282_s3 = inlined_call_operand.vmem [shape: bf16[2048,32], index: 3, kind: input, shape index: {}]   ;;  %s3283_s2 = inlined_call_operand.vmem [shape: f32[1,2048], index: 2, kind: input, shape index: {}]   ;;  %s3284_s4 = inlined_call_operand.vmem [shape: f32[1,32], index: 4, kind: input, shape index: {}]   ;;  %s3285_s5 = inlined_call_operand.vmem [shape: f32[1,32], index: 5, kind: input, shape index: {}]   ;;  %s3286_s6 = inlined_call_operand.vmem [shape: f32[1,32], index: 6, kind: input, shape index: {}]   ;;  %s3287_s7 = inlined_call_operand.vmem [shape: f32[16,32], index: 7, kind: output, shape index: {}]  }
   0x1   :  { %v46_v0 = vld [vmem:[%s3280_s1 + $0x80] sm:$0xff]  ;;  %v47_v2 = vld [vmem:[%s3280_s1 + $0x88] sm:$0xff]  ;;  %342 = vmatprep.mubr.bf16.mxu0 %v2596_v3  ;;  %385 = vmatprep.mubr.bf16.mxu1 %v2596_v3  ;;  %v48_v16 = vld [vmem:[%s3280_s1 + $0x90] sm:$0xff] }
   0x2   :  { %v54_v1 = vld [vmem:[%s3280_s1 + $0xc0] sm:$0xff]  ;;  %v55_v5 = vld [vmem:[%s3280_s1 + $0xc8] sm:$0xff]  ;;  %v56_v17 = vld [vmem:[%s3280_s1 + $0xd0] sm:$0xff] }
   0x3   :  { %v2131_v4 = vcombine.high %v46_v0, %v54_v1  ;;  %v2130_v6 = vcombine.low %v46_v0, %v54_v1  ;;  %v30_v7 = vld [vmem:[%s3280_s1] sm:$0xff]  ;;  %v2133_v9 = vcombine.high %v47_v2, %v55_v5  ;;  %v2132_v10 = vcombine.low %v47_v2, %v55_v5  ;;  %v31_v12 = vld [vmem:[%s3280_s1 + $0x8] sm:$0xff]  ;;  %v49_v20 = vld [vmem:[%s3280_s1 + $0x98] sm:$0xff] }
   0x4   :  { %v38_v8 = vld [vmem:[%s3280_s1 + $0x40] sm:$0xff]  ;;  %v39_v13 = vld [vmem:[%s3280_s1 + $0x48] sm:$0xff]  ;;  %v57_v21 = vld [vmem:[%s3280_s1 + $0xd8] sm:$0xff]  ;;  %v2135_v23 = vcombine.high %v48_v16, %v56_v17  ;;  %v2134_v30 = vcombine.low %v48_v16, %v56_v17 }
   0x5   :  { %v2115_v11 = vcombine.high %v30_v7, %v38_v8  ;;  %322 = vmatprep.subr.bf16.mxu0 %v2131_v4  ;;  %v2117_v14 = vcombine.high %v31_v12, %v39_v13  ;;  %v27_v15 = vld [vmem:[%s3281_s0] sm:$0xff]  ;;  %365 = vmatprep.subr.bf16.mxu1 %v2133_v9  ;;  %v2114_v18 = vcombine.low %v30_v7, %v38_v8  ;;  %v28_v19 = vld [vmem:[%s3281_s0 + $0x8] sm:$0xff]  ;;  %v32_v25 = vld [vmem:[%s3280_s1 + $0x10] sm:$0xff] }
   0x6   :  { %323 = vmatpush1.bf16.msra.mxu0 %v2130_v6  ;;  %366 = vmatpush1.bf16.msra.mxu1 %v2132_v10  ;;  %v2116_v22 = vcombine.low %v31_v12, %v39_v13  ;;  %v2137_v24 = vcombine.high %v49_v20, %v57_v21  ;;  %v40_v26 = vld [vmem:[%s3280_s1 + $0x50] sm:$0xff]  ;;  %v2687_v27 = vpack.c.bf16 %v28_v19, %v27_v15  ;;  %v33_v28 = vld [vmem:[%s3280_s1 + $0x18] sm:$0xff]  ;;  %v50_v34 = vld [vmem:[%s3280_s1 + $0xa0] sm:$0xff] }
   0x7   :  { %324 = vmatprep.subr.bf16.mxu0 %v2115_v11  ;;  %367 = vmatprep.subr.bf16.mxu1 %v2117_v14  ;;  %v41_v29 = vld [vmem:[%s3280_s1 + $0x58] sm:$0xff]  ;;  %v2136_v31 = vcombine.low %v49_v20, %v57_v21  ;;  %v2119_v32 = vcombine.high %v32_v25, %v40_v26  ;;  %v58_v35 = vld [vmem:[%s3280_s1 + $0xe0] sm:$0xff]  ;;  %v51_v36 = vld [vmem:[%s3280_s1 + $0xa8] sm:$0xff]  ;;  %v2118_v38 = vcombine.low %v32_v25, %v40_v26 }
   0x8   :  { %v2121_v33 = vcombine.high %v33_v28, %v41_v29  ;;  %v59_v37 = vld [vmem:[%s3280_s1 + $0xe8] sm:$0xff]  ;;  %v34_v39 = vld [vmem:[%s3280_s1 + $0x20] sm:$0xff]  ;;  %v2120_v40 = vcombine.low %v33_v28, %v41_v29  ;;  %v2139_v41 = vcombine.high %v50_v34, %v58_v35  ;;  %v2138_v46 = vcombine.low %v50_v34, %v58_v35  ;;  %v52_v47 = vld [vmem:[%s3280_s1 + $0xb0] sm:$0xff] }
   0x9   :  { %v42_v42 = vld [vmem:[%s3280_s1 + $0x60] sm:$0xff]  ;;  %v2141_v43 = vcombine.high %v51_v36, %v59_v37  ;;  %v35_v44 = vld [vmem:[%s3280_s1 + $0x28] sm:$0xff]  ;;  %v2140_v48 = vcombine.low %v51_v36, %v59_v37  ;;  %v60_v50 = vld [vmem:[%s3280_s1 + $0xf0] sm:$0xff] }
   0xa   :  { %325 = vmatpush1.bf16.msra.mxu0 %v2114_v18  ;;  %368 = vmatpush1.bf16.msra.mxu1 %v2116_v22  ;;  %v43_v45 = vld [vmem:[%s3280_s1 + $0x68] sm:$0xff]  ;;  %v2123_v49 = vcombine.high %v34_v39, %v42_v42  ;;  %v53_v52 = vld [vmem:[%s3280_s1 + $0xb8] sm:$0xff]  ;;  %v2122_v54 = vcombine.low %v34_v39, %v42_v42  ;;  %v36_v55 = vld [vmem:[%s3280_s1 + $0x30] sm:$0xff]  ;;  %v2143_v57 = vcombine.high %v52_v47, %v60_v50 }
   0xb   :  { %408 = vmatprep.subr.bf16.mxu0 %v2135_v23  ;;  %451 = vmatprep.subr.bf16.mxu1 %v2137_v24  ;;  %v2125_v51 = vcombine.high %v35_v44, %v43_v45  ;;  %v61_v53 = vld [vmem:[%s3280_s1 + $0xf8] sm:$0xff]  ;;  %v2124_v56 = vcombine.low %v35_v44, %v43_v45  ;;  %v44_v58 = vld [vmem:[%s3280_s1 + $0x70] sm:$0xff]  ;;  %v2142_v62 = vcombine.low %v52_v47, %v60_v50  ;;  %v2470_v12 = vld [vmem:[%s3282_s3 + $0x68] sm:$0xff]  }
   0xc   :  { %v2145_v59 = vcombine.high %v53_v52, %v61_v53  ;;  %v37_v60 = vld [vmem:[%s3280_s1 + $0x38] sm:$0xff]  ;;  %v2144_v63 = vcombine.low %v53_v52, %v61_v53  ;;  %v2127_v0 = vcombine.high %v36_v55, %v44_v58  ;;  %v2126_v2 = vcombine.low %v36_v55, %v44_v58  ;;  %v2466_v9 = vld [vmem:[%s3282_s3 + $0x70] sm:$0xff]   ;;  %v2471_v13 = vld [vmem:[%s3282_s3 + $0xe8] sm:$0xff]  }
   0xd   :  { %2146 = vmatmul.mubr.msk.bf16.vlgmr.msra.gmra.mxu0 %vm306_vm0, %v2687_v27  ;;  %2147 = vmatmul.mubr.msk.bf16.vlgmr.msra.gmra.mxu1 %vm306_vm0, %v2687_v27  ;;  %v45_v61 = vld [vmem:[%s3280_s1 + $0x78] sm:$0xff]  ;;  %v2467_v10 = vld [vmem:[%s3282_s3 + $0xf0] sm:$0xff]   ;;  %v2472_v14 = vld [vmem:[%s3282_s3 + $0x28] sm:$0xff]  }
   0xe   :  { %409 = vmatpush1.bf16.msra.mxu0 %v2134_v30  ;;  %452 = vmatpush1.bf16.msra.mxu1 %v2136_v31  ;;  %v2129_v1 = vcombine.high %v37_v60, %v45_v61  ;;  %v2462_v4 = vld [vmem:[%s3282_s3 + $0x78] sm:$0xff]   ;;  %v2128_v5 = vcombine.low %v37_v60, %v45_v61  ;;  %v2469_v11 = vld [vmem:[%s3282_s3 + $0xb0] sm:$0xff]   ;;  %v2473_v15 = vld [vmem:[%s3282_s3 + $0xa8] sm:$0xff]  }
   0xf   :  { %410 = vmatprep.subr.bf16.mxu0 %v2119_v32  ;;  %453 = vmatprep.subr.bf16.mxu1 %v2121_v33  ;;  %v2463_v6 = vld [vmem:[%s3282_s3 + $0xf8] sm:$0xff]   ;;  %v2474_v16 = vld [vmem:[%s3282_s3 + $0x60] sm:$0xff]   ;;  %v2482_v24 = vld [vmem:[%s3282_s3 + $0x50] sm:$0xff]  }
  0x10   :  { %428 = vmatprep.mubr.bf16.mxu0 %v2596_v3  ;;  %471 = vmatprep.mubr.bf16.mxu1 %v2596_v3  ;;  %v2464_v7 = vld [vmem:[%s3282_s3 + $0x38] sm:$0xff]   ;;  %v2475_v17 = vld [vmem:[%s3282_s3 + $0xe0] sm:$0xff]   ;;  %v2483_v25 = vld [vmem:[%s3282_s3 + $0xd0] sm:$0xff]  }
  0x11   :  { %v2465_v8 = vld [vmem:[%s3282_s3 + $0xb8] sm:$0xff]   ;;  %v2476_v18 = vld [vmem:[%s3282_s3 + $0x20] sm:$0xff]   ;;  %v2484_v26 = vld [vmem:[%s3282_s3 + $0x10] sm:$0xff]  }
  0x12   :  { %411 = vmatpush1.bf16.msra.mxu0 %v2118_v38  ;;  %454 = vmatpush1.bf16.msra.mxu1 %v2120_v40  ;;  %v2477_v19 = vld [vmem:[%s3282_s3 + $0xa0] sm:$0xff]   ;;  %v2478_v20 = vld [vmem:[%s3282_s3 + $0x58] sm:$0xff]   ;;  %v2486_v28 = vld [vmem:[%s3282_s3 + $0x48] sm:$0xff]   ;;  %v66_v38 = vlaneseq }
  0x13   :  { %494 = vmatprep.subr.bf16.mxu0 %v2139_v41  ;;  %537 = vmatprep.subr.bf16.mxu1 %v2141_v43  ;;  %v2479_v21 = vld [vmem:[%s3282_s3 + $0xd8] sm:$0xff]   ;;  %v2487_v29 = vld [vmem:[%s3282_s3 + $0xc8] sm:$0xff]   ;;  %v2490_v32 = vld [vmem:[%s3282_s3 + $0x40] sm:$0xff]  }
  0x14   :  { %v2480_v22 = vld [vmem:[%s3282_s3 + $0x18] sm:$0xff]   ;;  %v2488_v30 = vld [vmem:[%s3282_s3 + $0x8] sm:$0xff]   ;;  %v2491_v33 = vld [vmem:[%s3282_s3 + $0xc0] sm:$0xff]   ;;  %v2867_v39 = vshrl.u32 %v66_v38, 7 }
  0x15   :  { %2148 = vmatmul.mubr.msk.bf16.vlgmr.msra.gmra.mxu0 %vm306_vm0, %v2687_v27  ;;  %2149 = vmatmul.mubr.msk.bf16.vlgmr.msra.gmra.mxu1 %vm306_vm0, %v2687_v27  ;;  %v2481_v23 = vld [vmem:[%s3282_s3 + $0x98] sm:$0xff]   ;;  %v2489_v31 = vld [vmem:[%s3282_s3 + $0x88] sm:$0xff]   ;;  %v2492_v34 = vld [vmem:[%s3282_s3] sm:$0xff]  }
  0x16   :  { %495 = vmatpush1.bf16.msra.mxu0 %v2138_v46  ;;  %538 = vmatpush1.bf16.msra.mxu1 %v2140_v48  ;;  %v2493_v35 = vld [vmem:[%s3282_s3 + $0x80] sm:$0xff]   ;;  %v2494_v36 = vld [vmem:[%s3282_s3 + $0x178] sm:$0xff]   ;;  %v72_v40 = vsub.s32 1, %v2867_v39  ;;  %v68_v41 = vsub.s32 0, %v2867_v39  ;;  %v80_v42 = vsub.s32 3, %v2867_v39  ;;  %v76_v44 = vsub.s32 2, %v2867_v39 }
  0x17   :  { %496 = vmatprep.subr.bf16.mxu0 %v2123_v49  ;;  %539 = vmatprep.subr.bf16.mxu1 %v2125_v51  ;;  %v2495_v37 = vld [vmem:[%s3282_s3 + $0x1f8] sm:$0xff]   ;;  %v2875_v43 = vld [vmem:[%s3283_s2] sm:$0xff]  ;;  %v88_v53 = vsub.s32 5, %v2867_v39  ;;  %v96_v55 = vsub.s32 7, %v2867_v39  ;;  %v2503_v38 = vld [vmem:[%s3282_s3 + $0x1e8] sm:$0xff]  }
  0x18   :  { %514 = vmatprep.mubr.bf16.mxu0 %v2596_v3  ;;  %557 = vmatprep.mubr.bf16.mxu1 %v2596_v3  ;;  %v73_v47 = vrot.slane %v2875_v43, %v72_v40  ;;  %v69_v48 = vrot.slane %v2875_v43, %v68_v41  ;;  %v81_v50 = vrot.slane %v2875_v43, %v80_v42 }
  0x19   :  { %v77_v51 = vrot.slane %v2875_v43, %v76_v44 }
  0x1a   :  { %497 = vmatpush1.bf16.msra.mxu0 %v2122_v54  ;;  %540 = vmatpush1.bf16.msra.mxu1 %v2124_v56 }
  0x1b   :  { %580 = vmatprep.subr.bf16.mxu0 %v2143_v57  ;;  %623 = vmatprep.subr.bf16.mxu1 %v2145_v59 }
  0x1d   :  { %2150 = vmatmul.mubr.msk.bf16.vlgmr.msra.gmra.mxu0 %vm306_vm0, %v2687_v27  ;;  %2151 = vmatmul.mubr.msk.bf16.vlgmr.msra.gmra.mxu1 %vm306_vm0, %v2687_v27 }
  0x1e   :  { %581 = vmatpush1.bf16.msra.mxu0 %v2142_v62  ;;  %624 = vmatpush1.bf16.msra.mxu1 %v2144_v63 }
  0x1f   :  { %582 = vmatprep.subr.bf16.mxu0 %v2127_v0  ;;  %625 = vmatprep.subr.bf16.mxu1 %v2129_v1 }
  0x20   :  { %600 = vmatprep.mubr.bf16.mxu0 %v2596_v3  ;;  %643 = vmatprep.mubr.bf16.mxu1 %v2596_v3  ;;  %v2468_v3 = vld [vmem:[%s3282_s3 + $0x30] sm:$0xff]  }
  0x22   :  { %583 = vmatpush1.bf16.msra.mxu0 %v2126_v2  ;;  %626 = vmatpush1.bf16.msra.mxu1 %v2128_v5  ;;  %v89_v2 = vrot.slane %v2875_v43, %v88_v53 }
  0x23   :  { %2285 = vmatprep.subr.bf16.mxu0 %v2462_v4  ;;  %2307 = vmatprep.subr.bf16.mxu1 %v2463_v6 }
  0x25   :  { %2152 = vmatmul.mubr.msk.bf16.vlgmr.msra.gmra.mxu0 %vm306_vm0, %v2687_v27  ;;  %2153 = vmatmul.mubr.msk.bf16.vlgmr.msra.gmra.mxu1 %vm306_vm0, %v2687_v27  ;;  %v2485_v27 = vld [vmem:[%s3282_s3 + $0x90] sm:$0xff]  }
  0x26   :  { %2286 = vmatpush3.bf16.msra.mxu0 %v2464_v7  ;;  %2308 = vmatpush3.bf16.msra.mxu1 %v2465_v8  ;;  %v97_v7 = vrot.slane %v2875_v43, %v96_v55 }
  0x27   :  { %2287 = vmatprep.subr.bf16.mxu0 %v2466_v9  ;;  %2309 = vmatprep.subr.bf16.mxu1 %v2467_v10 }
  0x2a   :  { %2288 = vmatpush3.bf16.msra.mxu0 %v2468_v3  ;;  %2310 = vmatpush3.bf16.msra.mxu1 %v2469_v11 }
  0x2b   :  { %2289 = vmatprep.subr.bf16.mxu0 %v2470_v12  ;;  %2311 = vmatprep.subr.bf16.mxu1 %v2471_v13 }
  0x2e   :  { %2290 = vmatpush3.bf16.msra.mxu0 %v2472_v14  ;;  %2312 = vmatpush3.bf16.msra.mxu1 %v2473_v15 }
  0x2f   :  { %2291 = vmatprep.subr.bf16.mxu0 %v2474_v16  ;;  %2313 = vmatprep.subr.bf16.mxu1 %v2475_v17  ;;  %v2496_v17 = vld [vmem:[%s3282_s3 + $0x138] sm:$0xff]  }
  0x32   :  { %2292 = vmatpush3.bf16.msra.mxu0 %v2476_v18  ;;  %2314 = vmatpush3.bf16.msra.mxu1 %v2477_v19 }
  0x33   :  { %2293 = vmatprep.subr.bf16.mxu0 %v2478_v20  ;;  %2315 = vmatprep.subr.bf16.mxu1 %v2479_v21 }
  0x36   :  { %2294 = vmatpush3.bf16.msra.mxu0 %v2480_v22  ;;  %2316 = vmatpush3.bf16.msra.mxu1 %v2481_v23  ;;  %v2497_v22 = vld [vmem:[%s3282_s3 + $0x1b8] sm:$0xff]   ;;  %v2498_v23 = vld [vmem:[%s3282_s3 + $0x170] sm:$0xff]  }
  0x37   :  { %2295 = vmatprep.subr.bf16.mxu0 %v2482_v24  ;;  %2317 = vmatprep.subr.bf16.mxu1 %v2483_v25 }
  0x3a   :  { %2296 = vmatpush3.bf16.msra.mxu0 %v2484_v26  ;;  %2318 = vmatpush3.bf16.msra.mxu1 %v2485_v27  ;;  %v2499_v27 = vld [vmem:[%s3282_s3 + $0x1f0] sm:$0xff]  }
  0x3b   :  { %2297 = vmatprep.subr.bf16.mxu0 %v2486_v28  ;;  %2319 = vmatprep.subr.bf16.mxu1 %v2487_v29 }
  0x3e   :  { %2298 = vmatpush3.bf16.msra.mxu0 %v2488_v30  ;;  %2320 = vmatpush3.bf16.msra.mxu1 %v2489_v31  ;;  %v2500_v30 = vld [vmem:[%s3282_s3 + $0x130] sm:$0xff]  }
  0x3f   :  { %2299 = vmatprep.subr.bf16.mxu0 %v2490_v32  ;;  %2321 = vmatprep.subr.bf16.mxu1 %v2491_v33 }
  0x42   :  { %2300 = vmatpush3.bf16.msra.mxu0 %v2492_v34  ;;  %2322 = vmatpush3.bf16.msra.mxu1 %v2493_v35  ;;  %v2501_v34 = vld [vmem:[%s3282_s3 + $0x1b0] sm:$0xff]   ;;  %v2502_v35 = vld [vmem:[%s3282_s3 + $0x168] sm:$0xff]  }
  0x43   :  { %2329 = vmatprep.subr.bf16.mxu0 %v2494_v36  ;;  %2351 = vmatprep.subr.bf16.mxu1 %v2495_v37 }
  0xcd   :  { %v344_v45 = vpop.f32.mrf.mxu0  ;;  %v387_v46 = vpop.f32.mrf.mxu1 }
  0xce   :  { %v345_v59 = vadd.f32 %v344_v45, %v69_v48  ;;  %v388_v63 = vadd.f32 %v387_v46, %v77_v51 }
  0xcf   :  { %v346_v49 = vpop.f32.mrf.mxu0  ;;  %v389_v52 = vpop.f32.mrf.mxu1 }
  0xd0   :  { %v347_v56 = vadd.f32 %v346_v49, %v73_v47  ;;  %v390_v60 = vadd.f32 %v389_v52, %v81_v50  ;;  %v654_v11 = vmax.f32 %v345_v59, 0.0  ;;  %v656_v15 = vmax.f32 %v388_v63, 0.0  ;;  %v2505_v49 = vld [vmem:[%s3282_s3 + $0x1a8] sm:$0xff]   ;;  %v2507_v52 = vld [vmem:[%s3282_s3 + $0x1e0] sm:$0xff]   ;;  %v2510_v59 = vld [vmem:[%s3282_s3 + $0x158] sm:$0xff]  }
  0xd1   :  { %v348_v54 = vpop.f32.mrf.mxu0  ;;  %v391_v58 = vpop.f32.mrf.mxu1 }
  0xd2   :  { %v349_v57 = vadd.f32 %v348_v54, %v69_v48  ;;  %v392_v61 = vadd.f32 %v391_v58, %v77_v51  ;;  %v655_v8 = vmax.f32 %v347_v56, 0.0  ;;  %v657_v12 = vmax.f32 %v390_v60, 0.0  ;;  %v2508_v56 = vld [vmem:[%s3282_s3 + $0x120] sm:$0xff]   ;;  %v2511_v60 = vld [vmem:[%s3282_s3 + $0x1d8] sm:$0xff]  }
  0xd3   :  { %v350_v62 = vpop.f32.mrf.mxu0  ;;  %v393_v1 = vpop.f32.mrf.mxu1  ;;  %v2509_v58 = vld [vmem:[%s3282_s3 + $0x1a0] sm:$0xff]  }
  0xd4   :  { %v351_v0 = vadd.f32 %v350_v62, %v73_v47  ;;  %v670_v4 = vmax.f32 %v349_v57, 0.0  ;;  %v394_v5 = vadd.f32 %v393_v1, %v81_v50  ;;  %v672_v9 = vmax.f32 %v392_v61, 0.0  ;;  %v2504_v47 = vld [vmem:[%s3282_s3 + $0x128] sm:$0xff]   ;;  %v2506_v50 = vld [vmem:[%s3282_s3 + $0x160] sm:$0xff]   ;;  %v2512_v62 = vld [vmem:[%s3282_s3 + $0x118] sm:$0xff]  }
  0xd5   :  { %v2895_v6 = vpop.f32.mrf.mxu0  ;;  %v2900_v3 = vpop.f32.mrf.mxu1  ;;  %v2513_v1 = vld [vmem:[%s3282_s3 + $0x198] sm:$0xff]  }
  0xd6   :  { %v671_v10 = vmax.f32 %v351_v0, 0.0  ;;  %v673_v13 = vmax.f32 %v394_v5, 0.0  ;;  %v686_v20 = vpack.c.bf16 %v670_v4, %v654_v11  ;;  %v688_v26 = vpack.c.bf16 %v672_v9, %v656_v15  ;;  %v2515_v5 = vld [vmem:[%s3282_s3 + $0x1d0] sm:$0xff]   ;;  %v2519_v15 = vld [vmem:[%s3282_s3 + $0x1c8] sm:$0xff]  }
  0xd7   :  { %v432_v14 = vpop.f32.mrf.mxu0  ;;  %v475_v19 = vpop.f32.mrf.mxu1  ;;  %v84_v0 = vsub.s32 4, %v2867_v39  ;;  %v92_v4 = vsub.s32 6, %v2867_v39  ;;  %v2516_v9 = vld [vmem:[%s3282_s3 + $0x110] sm:$0xff]   ;;  %v2585_v39 = vld [vmem:[%s3282_s3 + $0x388] sm:$0xff]  }
  0xd8   :  { %v687_v16 = vpack.c.bf16 %v671_v10, %v655_v8  ;;  %v433_v18 = vadd.f32 %v432_v14, %v89_v2  ;;  %v689_v21 = vpack.c.bf16 %v673_v13, %v657_v12  ;;  %v476_v25 = vadd.f32 %v475_v19, %v97_v7  ;;  %v2517_v12 = vld [vmem:[%s3282_s3 + $0x190] sm:$0xff]   ;;  %v2518_v13 = vld [vmem:[%s3282_s3 + $0x148] sm:$0xff]  }
  0xd9   :  { %v2911_v24 = vpop.f32.mrf.mxu0  ;;  %v2916_v28 = vpop.f32.mrf.mxu1  ;;  %v85_v11 = vrot.slane %v2875_v43, %v84_v0  ;;  %v93_v14 = vrot.slane %v2875_v43, %v92_v4  ;;  %v2520_v19 = vld [vmem:[%s3282_s3 + $0x108] sm:$0xff]  }
  0xda   :  { %1765 = vmatprep.mubr.bf16.mxu0 %v687_v16  ;;  %1806 = vmatprep.mubr.bf16.mxu1 %v689_v21  ;;  %v659_v31 = vmax.f32 %v433_v18, 0.0  ;;  %v661_v36 = vmax.f32 %v476_v25, 0.0 }
  0xdb   :  { %1766 = vmatmul.mubr.bf16.vlgmr.msra.gmra.mxu0 %v686_v20  ;;  %v436_v29 = vpop.f32.mrf.mxu0  ;;  %1807 = vmatmul.mubr.bf16.vlgmr.msra.gmra.mxu1 %v688_v26  ;;  %v479_v33 = vpop.f32.mrf.mxu1  ;;  %v431_v20 = vadd.f32 %v2895_v6, %v85_v11  ;;  %v435_v21 = vadd.f32 %v2911_v24, %v85_v11  ;;  %v2523_v6 = vld [vmem:[%s3282_s3 + $0x1c0] sm:$0xff]  }
  0xdc   :  { %2330 = vmatpush3.bf16.msra.mxu0 %v2496_v17  ;;  %v437_v32 = vadd.f32 %v436_v29, %v89_v2  ;;  %2352 = vmatpush3.bf16.msra.mxu1 %v2497_v22  ;;  %v480_v37 = vadd.f32 %v479_v33, %v97_v7  ;;  %v2514_v2 = vld [vmem:[%s3282_s3 + $0x150] sm:$0xff]   ;;  %v2975_v7 = vld [vmem:[%s3283_s2 + $0x8] sm:$0xff]  ;;  %v474_v22 = vadd.f32 %v2900_v3, %v93_v14  ;;  %v2524_v29 = vld [vmem:[%s3282_s3 + $0x100] sm:$0xff]  }
  0xdd   :  { %2331 = vmatprep.subr.bf16.mxu0 %v2498_v23  ;;  %2353 = vmatprep.subr.bf16.mxu1 %v2499_v27  ;;  %v2942_v54 = vpop.f32.mrf.mxu0  ;;  %v2947_v57 = vpop.f32.mrf.mxu1  ;;  %v105_v16 = vrot.slane %v2975_v7, %v72_v40  ;;  %v113_v17 = vrot.slane %v2975_v7, %v80_v42  ;;  %v2521_v40 = vld [vmem:[%s3282_s3 + $0x188] sm:$0xff]   ;;  %v2522_v42 = vld [vmem:[%s3282_s3 + $0x140] sm:$0xff]   ;;  %v478_v23 = vadd.f32 %v2916_v28, %v93_v14  ;;  %v2526_v28 = vld [vmem:[%s3282_s3 + $0x278] sm:$0xff]  }
  0xde   :  { %v675_v45 = vmax.f32 %v437_v32, 0.0  ;;  %v677_v46 = vmax.f32 %v480_v37, 0.0  ;;  %v2525_v3 = vld [vmem:[%s3282_s3 + $0x180] sm:$0xff]   ;;  %v660_v32 = vmax.f32 %v474_v22, 0.0  ;;  %v2550_v22 = vld [vmem:[%s3282_s3 + $0x248] sm:$0xff]  }
  0xdf   :  { %v518_v61 = vpop.f32.mrf.mxu0  ;;  %v561_v63 = vpop.f32.mrf.mxu1  ;;  %v676_v33 = vmax.f32 %v478_v23, 0.0  ;;  %v2541_v11 = vld [vmem:[%s3282_s3 + $0x2a0] sm:$0xff]   ;;  %v109_v23 = vrot.slane %v2975_v7, %v76_v44 }
  0xe0   :  { %2332 = vmatpush3.bf16.msra.mxu0 %v2500_v30  ;;  %v691_v48 = vpack.c.bf16 %v675_v45, %v659_v31  ;;  %2354 = vmatpush3.bf16.msra.mxu1 %v2501_v34  ;;  %v693_v51 = vpack.c.bf16 %v677_v46, %v661_v36  ;;  %v519_v24 = vadd.f32 %v518_v61, %v105_v16  ;;  %v658_v30 = vmax.f32 %v431_v20, 0.0  ;;  %v2527_v34 = vld [vmem:[%s3282_s3 + $0x2f8] sm:$0xff]   ;;  %v2536_v61 = vld [vmem:[%s3282_s3 + $0x228] sm:$0xff]   ;;  %v2548_v20 = vld [vmem:[%s3282_s3 + $0x210] sm:$0xff]  }
  0xe1   :  { %2333 = vmatprep.subr.bf16.mxu0 %v2502_v35  ;;  %2355 = vmatprep.subr.bf16.mxu1 %v2503_v38  ;;  %v2977_v8 = vpop.f32.mrf.mxu0  ;;  %v2982_v10 = vpop.f32.mrf.mxu1  ;;  %v562_v26 = vadd.f32 %v561_v63, %v113_v17  ;;  %v674_v31 = vmax.f32 %v435_v21, 0.0  ;;  %v2528_v45 = vld [vmem:[%s3282_s3 + $0x238] sm:$0xff]   ;;  %v2538_v63 = vld [vmem:[%s3282_s3 + $0x260] sm:$0xff]  }
  0xe2   :  { %1847 = vmatprep.mubr.bf16.mxu0 %v691_v48  ;;  %1888 = vmatprep.mubr.bf16.mxu1 %v693_v51  ;;  %v663_v35 = vmax.f32 %v519_v24, 0.0  ;;  %v2530_v48 = vld [vmem:[%s3282_s3 + $0x270] sm:$0xff]   ;;  %v129_v24 = vrot.slane %v2975_v7, %v96_v55  ;;  %v2554_v55 = vld [vmem:[%s3282_s3 + $0x240] sm:$0xff]  }
  0xe3   :  { %v522_v18 = vpop.f32.mrf.mxu0  ;;  %v565_v43 = vpop.f32.mrf.mxu1  ;;  %v665_v37 = vmax.f32 %v562_v26, 0.0  ;;  %v690_v46 = vpack.c.bf16 %v674_v31, %v658_v30  ;;  %v2552_v26 = vld [vmem:[%s3282_s3 + $0x208] sm:$0xff]   ;;  %v560_v30 = vadd.f32 %v2947_v57, %v109_v23  ;;  %v564_v31 = vadd.f32 %v2982_v10, %v109_v23  ;;  %v2557_v57 = vld [vmem:[%s3282_s3 + $0x280] sm:$0xff]   ;;  %v2558_v10 = vld [vmem:[%s3282_s3 + $0x378] sm:$0xff]  }
  0xe4   :  { %2334 = vmatpush3.bf16.msra.mxu0 %v2504_v47  ;;  %2356 = vmatpush3.bf16.msra.mxu1 %v2505_v49  ;;  %v523_v25 = vadd.f32 %v522_v18, %v105_v16  ;;  %v566_v27 = vadd.f32 %v565_v43, %v113_v17  ;;  %v2529_v47 = vld [vmem:[%s3282_s3 + $0x2b8] sm:$0xff]   ;;  %v692_v49 = vpack.c.bf16 %v676_v33, %v660_v32  ;;  %v2546_v18 = vld [vmem:[%s3282_s3 + $0x250] sm:$0xff]   ;;  %v2556_v33 = vld [vmem:[%s3282_s3 + $0x200] sm:$0xff]  }
  0xe5   :  { %2335 = vmatprep.subr.bf16.mxu0 %v2506_v50  ;;  %2357 = vmatprep.subr.bf16.mxu1 %v2507_v52  ;;  %v2531_v50 = vld [vmem:[%s3282_s3 + $0x2f0] sm:$0xff]   ;;  %v2545_v17 = vld [vmem:[%s3282_s3 + $0x298] sm:$0xff]  }
  0xe6   :  { %v679_v36 = vmax.f32 %v523_v25, 0.0  ;;  %v681_v38 = vmax.f32 %v566_v27, 0.0  ;;  %v2581_v23 = vld [vmem:[%s3282_s3 + $0x390] sm:$0xff]  }
  0xe8   :  { %2336 = vmatpush3.bf16.msra.mxu0 %v2508_v56  ;;  %2358 = vmatpush3.bf16.msra.mxu1 %v2509_v58  ;;  %v695_v51 = vpack.c.bf16 %v679_v36, %v663_v35  ;;  %v697_v52 = vpack.c.bf16 %v681_v38, %v665_v37  ;;  %v2532_v56 = vld [vmem:[%s3282_s3 + $0x230] sm:$0xff]   ;;  %v664_v36 = vmax.f32 %v560_v30, 0.0  ;;  %v680_v37 = vmax.f32 %v564_v31, 0.0  ;;  %v2559_v38 = vld [vmem:[%s3282_s3 + $0x3f8] sm:$0xff]  }
  0xe9   :  { %2337 = vmatprep.subr.bf16.mxu0 %v2510_v59  ;;  %2359 = vmatprep.subr.bf16.mxu1 %v2511_v60  ;;  %v2533_v58 = vld [vmem:[%s3282_s3 + $0x2b0] sm:$0xff]   ;;  %v2534_v59 = vld [vmem:[%s3282_s3 + $0x268] sm:$0xff]  }
  0xea   :  { %v2535_v60 = vld [vmem:[%s3282_s3 + $0x2e8] sm:$0xff]  }
  0xec   :  { %2338 = vmatpush3.bf16.msra.mxu0 %v2512_v62  ;;  %2360 = vmatpush3.bf16.msra.mxu1 %v2513_v1  ;;  %v2537_v62 = vld [vmem:[%s3282_s3 + $0x2a8] sm:$0xff]   ;;  %v2539_v1 = vld [vmem:[%s3282_s3 + $0x2e0] sm:$0xff]  }
  0xed   :  { %2339 = vmatprep.subr.bf16.mxu0 %v2514_v2  ;;  %2361 = vmatprep.subr.bf16.mxu1 %v2515_v5  ;;  %v3069_v2 = vpop.f32.mrf.mxu0  ;;  %v2540_v5 = vld [vmem:[%s3282_s3 + $0x220] sm:$0xff]  }
  0xef   :  { %v604_v14 = vpop.f32.mrf.mxu0 }
  0xf0   :  { %2340 = vmatpush3.bf16.msra.mxu0 %v2516_v9  ;;  %2362 = vmatpush3.bf16.msra.mxu1 %v2517_v12  ;;  %v3074_v9 = vpop.f32.mrf.mxu1  ;;  %v2542_v12 = vld [vmem:[%s3282_s3 + $0x258] sm:$0xff]  }
  0xf1   :  { %2341 = vmatprep.subr.bf16.mxu0 %v2518_v13  ;;  %2363 = vmatprep.subr.bf16.mxu1 %v2519_v15  ;;  %v2543_v13 = vld [vmem:[%s3282_s3 + $0x2d8] sm:$0xff]   ;;  %v3097_v43 = vpop.f32.mrf.mxu0 }
  0xf2   :  { %v2544_v15 = vld [vmem:[%s3282_s3 + $0x218] sm:$0xff]   ;;  %v647_v16 = vpop.f32.mrf.mxu1 }
  0xf3   :  { %v608_v25 = vpop.f32.mrf.mxu0 }
  0xf4   :  { %2342 = vmatpush3.bf16.msra.mxu0 %v2520_v19  ;;  %2364 = vmatpush3.bf16.msra.mxu1 %v2521_v40  ;;  %v2547_v19 = vld [vmem:[%s3282_s3 + $0x2d0] sm:$0xff]   ;;  %v3102_v21 = vpop.f32.mrf.mxu1  ;;  %v101_v40 = vrot.slane %v2975_v7, %v68_v41  ;;  %v121_v41 = vrot.slane %v2975_v7, %v88_v53  ;;  %v2553_v53 = vld [vmem:[%s3282_s3 + $0x288] sm:$0xff]  }
  0xf5   :  { %2343 = vmatprep.subr.bf16.mxu0 %v2522_v42  ;;  %2365 = vmatprep.subr.bf16.mxu1 %v2523_v6  ;;  %v2549_v42 = vld [vmem:[%s3282_s3 + $0x290] sm:$0xff]   ;;  %v2551_v6 = vld [vmem:[%s3282_s3 + $0x2c8] sm:$0xff]  }
  0xf6   :  { %v651_v44 = vpop.f32.mrf.mxu1  ;;  %v517_v27 = vadd.f32 %v2942_v54, %v101_v40  ;;  %v2555_v54 = vld [vmem:[%s3282_s3 + $0x2c0] sm:$0xff]  }
  0xf7   :  { %v652_v32 = vadd.f32 %v651_v44, %v129_v24 }
  0xf8   :  { %2344 = vmatpush3.bf16.msra.mxu0 %v2524_v29  ;;  %2366 = vmatpush3.bf16.msra.mxu1 %v2525_v3  ;;  %v521_v29 = vadd.f32 %v2977_v8, %v101_v40  ;;  %v605_v8 = vadd.f32 %v604_v14, %v121_v41  ;;  %v609_v3 = vadd.f32 %v608_v25, %v121_v41  ;;  %v2572_v14 = vld [vmem:[%s3282_s3 + $0x320] sm:$0xff]   ;;  %v2579_v40 = vld [vmem:[%s3282_s3 + $0x3d0] sm:$0xff]  }
  0xf9   :  { %2373 = vmatprep.subr.bf16.mxu0 %v2526_v28  ;;  %2395 = vmatprep.subr.bf16.mxu1 %v2527_v34  ;;  %v648_v28 = vadd.f32 %v647_v16, %v129_v24  ;;  %v662_v34 = vmax.f32 %v517_v27, 0.0  ;;  %v2574_v16 = vld [vmem:[%s3282_s3 + $0x358] sm:$0xff]   ;;  %v125_v41 = vrot.slane %v2975_v7, %v92_v4  ;;  %v2583_v24 = vld [vmem:[%s3282_s3 + $0x3c8] sm:$0xff]   ;;  %v2586_v4 = vld [vmem:[%s3282_s3 + $0x340] sm:$0xff]  }
  0xfa   :  { %v678_v35 = vmax.f32 %v521_v29, 0.0 }
  0xfb   :  { %1848 = vmatmul.mubr.bf16.vlgmr.msra.gmra.mxu0 %v690_v46  ;;  %1889 = vmatmul.mubr.bf16.vlgmr.msra.gmra.mxu1 %v692_v49  ;;  %v683_v46 = vmax.f32 %v609_v3, 0.0  ;;  %v2560_v49 = vld [vmem:[%s3282_s3 + $0x338] sm:$0xff]   ;;  %v650_v44 = vadd.f32 %v3102_v21, %v125_v41 }
  0xfc   :  { %2374 = vmatpush3.bf16.msra.mxu0 %v2528_v45  ;;  %2396 = vmatpush3.bf16.msra.mxu1 %v2529_v47  ;;  %v667_v45 = vmax.f32 %v605_v8, 0.0  ;;  %v669_v47 = vmax.f32 %v648_v28, 0.0 }
  0xfd   :  { %2375 = vmatprep.subr.bf16.mxu0 %v2530_v48  ;;  %2397 = vmatprep.subr.bf16.mxu1 %v2531_v50  ;;  %v685_v48 = vmax.f32 %v652_v32, 0.0  ;;  %v694_v50 = vpack.c.bf16 %v678_v35, %v662_v34  ;;  %v684_v21 = vmax.f32 %v650_v44, 0.0 }
  0xfe   :  { %1929 = vmatprep.mubr.bf16.mxu0 %v695_v51  ;;  %1970 = vmatprep.mubr.bf16.mxu1 %v697_v52  ;;  %v2561_v51 = vld [vmem:[%s3282_s3 + $0x3b8] sm:$0xff]   ;;  %v2562_v52 = vld [vmem:[%s3282_s3 + $0x370] sm:$0xff]  }
 0x100   :  { %2376 = vmatpush3.bf16.msra.mxu0 %v2532_v56  ;;  %2398 = vmatpush3.bf16.msra.mxu1 %v2533_v58  ;;  %v696_v56 = vpack.c.bf16 %v680_v37, %v664_v36  ;;  %v2563_v58 = vld [vmem:[%s3282_s3 + $0x3f0] sm:$0xff]  }
 0x101   :  { %2377 = vmatprep.subr.bf16.mxu0 %v2534_v59  ;;  %2399 = vmatprep.subr.bf16.mxu1 %v2535_v60  ;;  %v699_v59 = vpack.c.bf16 %v683_v46, %v667_v45  ;;  %v701_v60 = vpack.c.bf16 %v685_v48, %v669_v47  ;;  %v2154_v47 = vld [vmem:[%s3284_s4] ss:$0 sm:$0xff] }
 0x104   :  { %2378 = vmatpush3.bf16.msra.mxu0 %v2536_v61  ;;  %2400 = vmatpush3.bf16.msra.mxu1 %v2537_v62  ;;  %v2564_v61 = vld [vmem:[%s3282_s3 + $0x330] sm:$0xff]  }
 0x105   :  { %2379 = vmatprep.subr.bf16.mxu0 %v2538_v63  ;;  %2401 = vmatprep.subr.bf16.mxu1 %v2539_v1  ;;  %v2565_v62 = vld [vmem:[%s3282_s3 + $0x3b0] sm:$0xff]   ;;  %v2566_v63 = vld [vmem:[%s3282_s3 + $0x368] sm:$0xff]  }
 0x106   :  { %v2567_v1 = vld [vmem:[%s3282_s3 + $0x3e8] sm:$0xff]  }
 0x108   :  { %2380 = vmatpush3.bf16.msra.mxu0 %v2540_v5  ;;  %2402 = vmatpush3.bf16.msra.mxu1 %v2541_v11  ;;  %v2568_v5 = vld [vmem:[%s3282_s3 + $0x328] sm:$0xff]  }
 0x109   :  { %2381 = vmatprep.subr.bf16.mxu0 %v2542_v12  ;;  %2403 = vmatprep.subr.bf16.mxu1 %v2543_v13  ;;  %v2569_v11 = vld [vmem:[%s3282_s3 + $0x3a8] sm:$0xff]   ;;  %v2570_v12 = vld [vmem:[%s3282_s3 + $0x360] sm:$0xff]  }
 0x10a   :  { %v2571_v13 = vld [vmem:[%s3282_s3 + $0x3e0] sm:$0xff]  }
 0x10c   :  { %2382 = vmatpush3.bf16.msra.mxu0 %v2544_v15  ;;  %2404 = vmatpush3.bf16.msra.mxu1 %v2545_v17  ;;  %v2573_v15 = vld [vmem:[%s3282_s3 + $0x3a0] sm:$0xff]   ;;  %v2575_v17 = vld [vmem:[%s3282_s3 + $0x3d8] sm:$0xff]  }
 0x10d   :  { %2383 = vmatprep.subr.bf16.mxu0 %v2546_v18  ;;  %2405 = vmatprep.subr.bf16.mxu1 %v2547_v19  ;;  %v2576_v18 = vld [vmem:[%s3282_s3 + $0x318] sm:$0xff]  }
 0x10e   :  { %v2577_v19 = vld [vmem:[%s3282_s3 + $0x398] sm:$0xff]  }
 0x110   :  { %2384 = vmatpush3.bf16.msra.mxu0 %v2548_v20  ;;  %2406 = vmatpush3.bf16.msra.mxu1 %v2549_v42  ;;  %v2578_v20 = vld [vmem:[%s3282_s3 + $0x350] sm:$0xff]  }
 0x111   :  { %2385 = vmatprep.subr.bf16.mxu0 %v2550_v22  ;;  %2407 = vmatprep.subr.bf16.mxu1 %v2551_v6  ;;  %v2580_v42 = vld [vmem:[%s3282_s3 + $0x310] sm:$0xff]   ;;  %v117_v22 = vrot.slane %v2975_v7, %v84_v0  ;;  %v2582_v6 = vld [vmem:[%s3282_s3 + $0x348] sm:$0xff]   ;;  %v646_v7 = vadd.f32 %v3074_v9, %v125_v41  ;;  %v2589_v9 = vld [vmem:[%s3282_s3 + $0x380] sm:$0xff]  }
 0x112   :  { %v2584_v0 = vld [vmem:[%s3282_s3 + $0x308] sm:$0xff]  }
 0x113   :  { %v603_v25 = vadd.f32 %v3069_v2, %v117_v22  ;;  %v2587_v2 = vld [vmem:[%s3282_s3 + $0x3c0] sm:$0xff]  }
 0x114   :  { %2386 = vmatpush3.bf16.msra.mxu0 %v2552_v26  ;;  %2408 = vmatpush3.bf16.msra.mxu1 %v2553_v53  ;;  %v607_v26 = vadd.f32 %v3097_v43, %v117_v22  ;;  %v2588_v43 = vld [vmem:[%s3282_s3 + $0x300] sm:$0xff]   ;;  %v668_v53 = vmax.f32 %v646_v7, 0.0 }
 0x115   :  { %2387 = vmatprep.subr.bf16.mxu0 %v2554_v55  ;;  %2409 = vmatprep.subr.bf16.mxu1 %v2555_v54  ;;  %v666_v27 = vmax.f32 %v603_v25, 0.0 }
 0x116   :  { %v682_v29 = vmax.f32 %v607_v26, 0.0  ;;  %v700_v30 = vpack.c.bf16 %v684_v21, %v668_v53 }
 0x118   :  { %2388 = vmatpush3.bf16.msra.mxu0 %v2556_v33  ;;  %2410 = vmatpush3.bf16.msra.mxu1 %v2557_v57  ;;  %v698_v55 = vpack.c.bf16 %v682_v29, %v666_v27 }
 0x119   :  { %2417 = vmatprep.subr.bf16.mxu0 %v2558_v10  ;;  %2439 = vmatprep.subr.bf16.mxu1 %v2559_v38 }
 0x11b   :  { %1930 = vmatmul.mubr.bf16.vlgmr.msra.gmra.mxu0 %v694_v50  ;;  %1971 = vmatmul.mubr.bf16.vlgmr.msra.gmra.mxu1 %v696_v56 }
 0x11c   :  { %2418 = vmatpush3.bf16.msra.mxu0 %v2560_v49  ;;  %2440 = vmatpush3.bf16.msra.mxu1 %v2561_v51 }
 0x11d   :  { %2419 = vmatprep.subr.bf16.mxu0 %v2562_v52  ;;  %2441 = vmatprep.subr.bf16.mxu1 %v2563_v58 }
 0x11e   :  { %2011 = vmatprep.mubr.bf16.mxu0 %v699_v59  ;;  %2052 = vmatprep.mubr.bf16.mxu1 %v701_v60 }
 0x120   :  { %2420 = vmatpush3.bf16.msra.mxu0 %v2564_v61  ;;  %2442 = vmatpush3.bf16.msra.mxu1 %v2565_v62 }
 0x121   :  { %2421 = vmatprep.subr.bf16.mxu0 %v2566_v63  ;;  %2443 = vmatprep.subr.bf16.mxu1 %v2567_v1 }
 0x124   :  { %2422 = vmatpush3.bf16.msra.mxu0 %v2568_v5  ;;  %2444 = vmatpush3.bf16.msra.mxu1 %v2569_v11 }
 0x125   :  { %2423 = vmatprep.subr.bf16.mxu0 %v2570_v12  ;;  %2445 = vmatprep.subr.bf16.mxu1 %v2571_v13 }
 0x128   :  { %2424 = vmatpush3.bf16.msra.mxu0 %v2572_v14  ;;  %2446 = vmatpush3.bf16.msra.mxu1 %v2573_v15 }
 0x129   :  { %2425 = vmatprep.subr.bf16.mxu0 %v2574_v16  ;;  %2447 = vmatprep.subr.bf16.mxu1 %v2575_v17 }
 0x12c   :  { %2426 = vmatpush3.bf16.msra.mxu0 %v2576_v18  ;;  %2448 = vmatpush3.bf16.msra.mxu1 %v2577_v19 }
 0x12d   :  { %2427 = vmatprep.subr.bf16.mxu0 %v2578_v20  ;;  %2449 = vmatprep.subr.bf16.mxu1 %v2579_v40 }
 0x130   :  { %2428 = vmatpush3.bf16.msra.mxu0 %v2580_v42  ;;  %2450 = vmatpush3.bf16.msra.mxu1 %v2581_v23 }
 0x131   :  { %2429 = vmatprep.subr.bf16.mxu0 %v2582_v6  ;;  %2451 = vmatprep.subr.bf16.mxu1 %v2583_v24 }
 0x134   :  { %2430 = vmatpush3.bf16.msra.mxu0 %v2584_v0  ;;  %2452 = vmatpush3.bf16.msra.mxu1 %v2585_v39 }
 0x135   :  { %2431 = vmatprep.subr.bf16.mxu0 %v2586_v4  ;;  %2453 = vmatprep.subr.bf16.mxu1 %v2587_v2 }
 0x138   :  { %2432 = vmatpush3.bf16.msra.mxu0 %v2588_v43  ;;  %2454 = vmatpush3.bf16.msra.mxu1 %v2589_v9 }
 0x13b   :  { %2012 = vmatmul.mubr.bf16.vlgmr.msra.gmra.mxu0 %v698_v55  ;;  %2053 = vmatmul.mubr.bf16.vlgmr.msra.gmra.mxu1 %v700_v30 }
 0x19b   :  { %v2301_v31 = vpop.f32.mrf.mxu0  ;;  %v2323_v54 = vpop.f32.mrf.mxu1 }
 0x19d   :  { %v2302_v8 = vpop.f32.mrf.mxu0  ;;  %v2324_v3 = vpop.f32.mrf.mxu1 }
 0x19e   :  { %v2303_v46 = vadd.f32 %v2302_v8, %v2301_v31  ;;  %v2325_v58 = vadd.f32 %v2324_v3, %v2323_v54  ;;  %v2594_v31 = vld [vmem:[%s3281_s0] sm:$0xff] }
 0x19f   :  { %v2304_v28 = vpop.f32.mrf.mxu0  ;;  %v2326_v32 = vpop.f32.mrf.mxu1 }
 0x1a0   :  { %v1768_v50 = vadd.f32 %v2303_v46, %v2154_v47 }
 0x1a1   :  { %v2305_v33 = vpop.f32.mrf.mxu0  ;;  %v2327_v35 = vpop.f32.mrf.mxu1 }
 0x1a2   :  { %v2306_v51 = vadd.f32 %v2305_v33, %v2304_v28  ;;  %v1809_v60 = vadd.f32 %v2325_v58, %v1768_v50  ;;  %v2328_v1 = vadd.f32 %v2327_v35, %v2326_v32  ;;  %v2595_v28 = vld [vmem:[%s3281_s0 + $0x8] sm:$0xff] }
 0x1a4   :  { %v1771_v61 = vadd.f32 %v2306_v51, %v2154_v47 }
 0x1a6   :  { %v1812_v12 = vadd.f32 %v2328_v1, %v1771_v61  ;;  %v2284_v61 = vld [vmem:[%s3286_s6] ss:$0 sm:$0xff] }
 0x1bb   :  { %v2345_v34 = vpop.f32.mrf.mxu0  ;;  %v2367_v57 = vpop.f32.mrf.mxu1 }
 0x1bd   :  { %v2346_v10 = vpop.f32.mrf.mxu0  ;;  %v2368_v36 = vpop.f32.mrf.mxu1 }
 0x1be   :  { %v2347_v59 = vadd.f32 %v2346_v10, %v2345_v34  ;;  %v2369_v13 = vadd.f32 %v2368_v36, %v2367_v57 }
 0x1bf   :  { %v2348_v37 = vpop.f32.mrf.mxu0  ;;  %v2370_v38 = vpop.f32.mrf.mxu1 }
 0x1c0   :  { %v1850_v5 = vadd.f32 %v2347_v59, %v1809_v60  ;;  %v2283_v59 = vld [vmem:[%s3285_s5] ss:$0 sm:$0xff] }
 0x1c1   :  { %v2349_v45 = vpop.f32.mrf.mxu0  ;;  %v2371_v49 = vpop.f32.mrf.mxu1 }
 0x1c2   :  { %v2350_v11 = vadd.f32 %v2349_v45, %v2348_v37  ;;  %v1891_v17 = vadd.f32 %v2369_v13, %v1850_v5  ;;  %v2372_v19 = vadd.f32 %v2371_v49, %v2370_v38 }
 0x1c4   :  { %v1853_v18 = vadd.f32 %v2350_v11, %v1812_v12 }
 0x1c6   :  { %v1894_v23 = vadd.f32 %v2372_v19, %v1853_v18 }
 0x1db   :  { %v2389_v48 = vpop.f32.mrf.mxu0  ;;  %v2411_v52 = vpop.f32.mrf.mxu1 }
 0x1dd   :  { %v2390_v56 = vpop.f32.mrf.mxu0  ;;  %v2412_v62 = vpop.f32.mrf.mxu1 }
 0x1de   :  { %v2391_v14 = vadd.f32 %v2390_v56, %v2389_v48  ;;  %v2413_v6 = vadd.f32 %v2412_v62, %v2411_v52 }
 0x1df   :  { %v2392_v63 = vpop.f32.mrf.mxu0  ;;  %v2414_v15 = vpop.f32.mrf.mxu1 }
 0x1e0   :  { %v1932_v20 = vadd.f32 %v2391_v14, %v1891_v17 }
 0x1e1   :  { %v2393_v16 = vpop.f32.mrf.mxu0  ;;  %v2415_v42 = vpop.f32.mrf.mxu1 }
 0x1e2   :  { %v2394_v40 = vadd.f32 %v2393_v16, %v2392_v63  ;;  %v1973_v0 = vadd.f32 %v2413_v6, %v1932_v20  ;;  %v2416_v7 = vadd.f32 %v2415_v42, %v2414_v15 }
 0x1e4   :  { %v1935_v25 = vadd.f32 %v2394_v40, %v1894_v23 }
 0x1e6   :  { %v1976_v29 = vadd.f32 %v2416_v7, %v1935_v25 }
 0x1fb   :  { %v2433_v22 = vpop.f32.mrf.mxu0  ;;  %v2455_v41 = vpop.f32.mrf.mxu1 }
 0x1fd   :  { %v2434_v24 = vpop.f32.mrf.mxu0  ;;  %v2456_v39 = vpop.f32.mrf.mxu1 }
 0x1fe   :  { %v2435_v26 = vadd.f32 %v2434_v24, %v2433_v22  ;;  %v2457_v2 = vadd.f32 %v2456_v39, %v2455_v41 }
 0x1ff   :  { %v2436_v4 = vpop.f32.mrf.mxu0  ;;  %v2458_v43 = vpop.f32.mrf.mxu1 }
 0x200   :  { %v2014_v44 = vadd.f32 %v2435_v26, %v1973_v0 }
 0x201   :  { %v2437_v27 = vpop.f32.mrf.mxu0  ;;  %v2459_v21 = vpop.f32.mrf.mxu1 }
 0x202   :  { %v2055_v9 = vadd.f32 %v2457_v2, %v2014_v44  ;;  %v2438_v53 = vadd.f32 %v2437_v27, %v2436_v4  ;;  %v2460_v30 = vadd.f32 %v2459_v21, %v2458_v43 }
 0x204   :  { %v2017_v55 = vadd.f32 %v2438_v53, %v1976_v29  ;;  %v2061_v54 = vadd.f32 %v2594_v31, %v2055_v9 }
 0x206   :  { %v2058_v8 = vadd.f32 %v2460_v30, %v2017_v55  ;;  %v2063_v3 = vsel %vm306_vm0, %v2061_v54, 0.0 }
 0x207   :  { %2064 = vadd.xlane.f32.xlu0 %v2063_v3 }
 0x208   :  { %v2062_v32 = vadd.f32 %v2595_v28, %v2058_v8 }
 0x20a   :  { %v2066_v33 = vsel %vm306_vm0, %v2062_v32, 0.0 }
 0x20b   :  { %2067 = vadd.xlane.f32.xlu0 %v2066_v33 }
 0x290   :  { %v2065_v34 = vpop.xlane.xlu0 %2064 }
 0x291   :  { %v2070_v35 = vmul.f32 0.03125, %v2065_v34 }
 0x293   :  { %v2072_v57 = vsub.f32 %v2061_v54, %v2070_v35 }
 0x294   :  { %v2068_v10 = vpop.xlane.xlu0 %2067 }
 0x295   :  { %v2071_v36 = vmul.f32 0.03125, %v2068_v10  ;;  %v2074_v37 = vmul.f32 %v2072_v57, %v2072_v57 }
 0x297   :  { %v2073_v38 = vsub.f32 %v2062_v32, %v2071_v36  ;;  %v2076_v45 = vsel %vm306_vm0, %v2074_v37, 0.0 }
 0x298   :  { %2077 = vadd.xlane.f32.xlu1 %v2076_v45 }
 0x299   :  { %v2075_v46 = vmul.f32 %v2073_v38, %v2073_v38 }
 0x29b   :  { %v2079_v47 = vsel %vm306_vm0, %v2075_v46, 0.0 }
 0x29c   :  { %2080 = vadd.xlane.f32.xlu1 %v2079_v47 }
 0x321   :  { %v2078_v48 = vpop.xlane.xlu1 %2077 }
 0x322   :  { %v2082_v49 = vmul.f32 0.03125, %v2078_v48 }
 0x324   :  { %v2084_v50 = vadd.f32 1e-05, %v2082_v49 }
 0x325   :  { %v2081_v51 = vpop.xlane.xlu1 %2080 }
 0x326   :  { %2590 = vrsqrt.f32 %v2084_v50  ;;  %v2083_v52 = vmul.f32 0.03125, %v2081_v51 }
 0x328   :  { %v2085_v56 = vadd.f32 1e-05, %v2083_v52 }
 0x32a   :  { %2592 = vrsqrt.f32 %v2085_v56 }
 0x333   :  { %v2591_v58 = vpop.eup %2590 }
 0x334   :  { %v2088_v60 = vmul.f32 %v2591_v58, %v2072_v57 }
 0x336   :  { %v2097_v62 = vmul.f32 %v2283_v59, %v2088_v60 }
 0x337   :  { %v2593_v63 = vpop.eup %2592 }
 0x338   :  { %v2106_v1 = vadd.f32 %v2284_v61, %v2097_v62  ;;  %v2089_v5 = vmul.f32 %v2593_v63, %v2073_v38 }
 0x33a   :  { %2108 = vst.msk [vmem:[%s3287_s7] sm:$0xff] %vm306_vm0, %v2106_v1  ;;  %v2098_v11 = vmul.f32 %v2283_v59, %v2089_v5 }
 0x33c   :  { %v2107_v12 = vadd.f32 %v2284_v61, %v2098_v11 }
 0x33e   :  { %2109 = vst.msk [vmem:[%s3287_s7 + $0x8] sm:$0xff] %vm306_vm0, %v2107_v12 }

</bundles_post_ra>
